<compile_context>
chip_gen: v7x
topology: tpu7x:2x2x1
jax: 0.10.0
libtpu: 0.0.40
codegen_flags: <defaults>
</compile_context>

<pallas_src>
import functools

import jax
import jax.numpy as jnp
from jax.experimental import pallas as pl
from jax.experimental.pallas import tpu as pltpu


# ---------------------------------------------------------------------------
# Kernels
# ---------------------------------------------------------------------------

def _gcn_rowpanel_kernel(adj_ref, x_ref, w_ref, o_ref, *, compute_dtype):
    """Collapsed-K path: one output row panel per grid step.

    o = tanh((adj_panel @ x) @ W); x and W are VMEM-resident.
    """
    adj = adj_ref[...]
    x = x_ref[...]
    if adj.dtype != compute_dtype:          # per-tile cast hides under adj DMA
        adj = adj.astype(compute_dtype)
    if x.dtype != compute_dtype:
        x = x.astype(compute_dtype)
    acc = jnp.dot(adj, x, preferred_element_type=jnp.float32)
    # Tiny epilogue kept in f32 (no bf16 rounding of the accumulator).
    pre = jnp.dot(acc, w_ref[...], preferred_element_type=jnp.float32)
    o_ref[...] = jnp.tanh(pre).astype(o_ref.dtype)   # tanh -> EUP slot


def _gcn_ktiled_kernel(adj_ref, x_ref, w_ref, o_ref, acc_ref, *,
                       tk, x_resident, compute_dtype):
    """K-tiled fallback: acc += adj_tile @ x_tile; epilogue on the last K step."""
    k = pl.program_id(1)

    @pl.when(k == 0)
    def _():
        acc_ref[...] = jnp.zeros_like(acc_ref)

    adj = adj_ref[...]
    if x_resident:
        start = pl.multiple_of(k * tk, tk)
        x_blk = x_ref[pl.ds(start, tk), :]   # x resident: slice, never re-DMA'd
    else:
        x_blk = x_ref[...]
    if adj.dtype != compute_dtype:
        adj = adj.astype(compute_dtype)
    if x_blk.dtype != compute_dtype:
        x_blk = x_blk.astype(compute_dtype)

    acc_ref[...] += jnp.dot(adj, x_blk, preferred_element_type=jnp.float32)

    @pl.when(k == pl.num_programs(1) - 1)
    def _():
        pre = jnp.dot(acc_ref[...], w_ref[...], preferred_element_type=jnp.float32)
        o_ref[...] = jnp.tanh(pre).astype(o_ref.dtype)


# ---------------------------------------------------------------------------
# Wrapper helpers
# ---------------------------------------------------------------------------

def _round_up(x, m):
    return ((x + m - 1) // m) * m


def _pad2(a, rows, cols):
    r, c = a.shape
    if r == rows and c == cols:
        return a                              # skip the extra XLA pass entirely
    return jnp.pad(a, ((0, rows - r), (0, cols - c)))


def _choose_tile(n, target, max_overhead=1.0 / 16.0):
    """Largest multiple of 128 <= target whose pad-to-multiple overhead on `n`
    stays under max_overhead (exact divisors have zero overhead) -- avoids the
    128*prime tile-collapse cliff for awkward N."""
    target = max(128, min(target, n))
    t = (target // 128) * 128
    while t > 128:
        if _round_up(n, t) - n <= max_overhead * n:
            return t
        t -= 128
    return 128


def _vmem_capacity_bytes():
    try:
        info = pltpu.get_tpu_info()
        cap = getattr(info, "vmem_capacity_bytes", None)
        if cap:
            return int(cap)
    except Exception:
        pass
    return 64 << 20   # conservative fallback == v7x per-TensorCore VMEM


def he_init(key, input_dim, output_dim, dtype=jnp.float32):
    # Faithful to the PyTorch module: kaiming_normal_ on an (in, out) tensor
    # uses fan_in = tensor.size(1) = output_dim (NOT the usual GCN fan-in).
    # Intentional fidelity -- do not "fix".
    std = jnp.sqrt(2.0 / output_dim).astype(dtype)
    return jax.random.normal(key, (input_dim, output_dim), dtype=dtype) * std


# ---------------------------------------------------------------------------
# Forward
# ---------------------------------------------------------------------------

def graph_conv_sparse_forward(inputs, adj, weight, *, tm=512, tk=1024,
                              compute_dtype=None, out_dtype=None,
                              force_path=None):
    """tanh(adj @ (inputs @ weight)) as one fused Pallas TPU kernel.

    compute_dtype: dtype fed to the big adj@x MXU pass (accumulation is f32;
                   the acc@W epilogue always runs in f32).  For the real HBM-BW
                   saving, store adj / inputs in bf16 (fp8 on v7x) caller-side.
    force_path:    None | 'collapsed' | 'ktiled_resident' | 'ktiled_stream'.
    """
    N, d_in = inputs.shape
    d_in_w, d_out = weight.shape
    assert d_in == d_in_w, "inputs / weight shape mismatch"
    assert adj.shape == (N, N), "adj must be (N, N)"

    out_dtype = jnp.dtype(out_dtype or inputs.dtype)
    compute_dtype = jnp.dtype(compute_dtype or inputs.dtype)

    adj_bpe = adj.dtype.itemsize
    x_bpe = inputs.dtype.itemsize
    cd_bpe = compute_dtype.itemsize
    out_bpe = out_dtype.itemsize

    n128 = _round_up(N, 128)
    dip = _round_up(d_in, 128)    # note: 256-multiples feed the v6e/v7x MXU better
    dop = _round_up(d_out, 128)   #       once the bf16 path is compute-bound

    cap = _vmem_capacity_bytes()            # 128 MiB v5e/v6e, 64 MiB per-TC v7x
    budget = int(cap * 0.8)

    # Row tile: biggest <= tm with small padding overhead; prefer >= 2 row
    # programs so the v7x megacore can split the 'parallel' axis.
    tm_eff = _choose_tile(n128, tm)
    if _round_up(n128, tm_eff) // tm_eff < 2 and n128 >= 256:
        tm_eff = _choose_tile(n128, max(128, tm_eff // 2))

    def _slack(b):
        return int(b * 1.2) + (1 << 20)

    def _collapsed_need(tm_):
        need = 2 * tm_ * n128 * adj_bpe            # double-buffered adj panel
        need += n128 * dip * x_bpe                 # x resident (single buffer)
        need += dip * dop * 4                      # W resident, f32
        need += 2 * tm_ * dop * out_bpe            # double-buffered output
        need += tm_ * dip * 4 + tm_ * dop * 4      # acc / pre temporaries
        if compute_dtype != adj.dtype:
            need += tm_ * n128 * cd_bpe            # in-kernel cast temp
        if compute_dtype != inputs.dtype:
            need += n128 * dip * cd_bpe
        return _slack(need)

    def _ktiled_need(tm_, tk_, cols_, x_res):
        need = 2 * tm_ * tk_ * adj_bpe
        need += (cols_ * dip * x_bpe) if x_res else (2 * tk_ * dip * x_bpe)
        need += dip * dop * 4
        need += 2 * tm_ * dop * out_bpe
        need += tm_ * dip * 4 + tm_ * dop * 4      # acc scratch + epilogue temp
        if compute_dtype != adj.dtype:
            need += tm_ * tk_ * cd_bpe
        if compute_dtype != inputs.dtype:
            need += tk_ * dip * cd_bpe
        return _slack(need)

    # ------------------------------ path selection --------------------------
    path = force_path
    tk_eff = None
    if path is None:
        cand = tm_eff
        while cand >= 128 and _collapsed_need(cand) > budget:
            cand -= 128
        if cand >= 128:
            path, tm_eff = "collapsed", cand
        else:
            tk_eff = _choose_tile(n128, tk)
            cols_try = _round_up(n128, tk_eff)
            path = ("ktiled_resident"
                    if _ktiled_need(tm_eff, tk_eff, cols_try, True) <= budget
                    else "ktiled_stream")

    if path == "collapsed":
        cols_p = n128
        need = _collapsed_need(tm_eff)
    else:
        if tk_eff is None:
            tk_eff = _choose_tile(n128, tk)
        cols_p = _round_up(n128, tk_eff)
        need = _ktiled_need(tm_eff, tk_eff, cols_p, path == "ktiled_resident")
    rows_p = _round_up(n128, tm_eff)

    # Pad only when required (zero padding is exact: padded adj cols / x rows /
    # W rows contribute nothing; extra output rows / cols are sliced off).
    # No dtype conversion here -- that would be an un-hidden extra HBM pass.
    adj_p = _pad2(adj, rows_p, cols_p)
    x_p = _pad2(inputs, cols_p, dip)
    w_f32 = weight if weight.dtype == jnp.float32 else weight.astype(jnp.float32)
    w_p = _pad2(w_f32, dip, dop)

    vmem_limit = int(min(int(cap * 0.9), max(need, 16 << 20)))

    cost = pl.CostEstimate(
        flops=2 * rows_p * cols_p * dip + 2 * rows_p * dip * dop,
        transcendentals=rows_p * dop,
        bytes_accessed=(rows_p * cols_p * adj_bpe + cols_p * dip * x_bpe
                        + dip * dop * 4 + rows_p * dop * out_bpe),
    )

    def _resident_spec(shape, index_map, single_buffer):
        # Constant-index blocks don't need double buffering; Buffered(1) frees
        # VMEM (matters most on v7x's 64 MiB).
        if single_buffer:
            return pl.BlockSpec(shape, index_map, pipeline_mode=pl.Buffered(1))
        return pl.BlockSpec(shape, index_map)

    def _run(single_buffer):
        if path == "collapsed":
            grid = (rows_p // tm_eff,)
            kernel = functools.partial(_gcn_rowpanel_kernel,
                                       compute_dtype=compute_dtype)
            in_specs = [
                # bump to pipeline_mode=pl.Buffered(3) if profiling shows
                # exposed DMA at step boundaries (short tiles on v7x):
                pl.BlockSpec((tm_eff, cols_p), lambda i: (i, 0)),          # adj
                _resident_spec((cols_p, dip), lambda i: (0, 0), single_buffer),  # x
                _resident_spec((dip, dop), lambda i: (0, 0), single_buffer),     # W
            ]
            out_spec = pl.BlockSpec((tm_eff, dop), lambda i: (i, 0))
            scratch = []
            dims = ("parallel",)
        else:
            grid = (rows_p // tm_eff, cols_p // tk_eff)
            x_res = (path == "ktiled_resident")
            kernel = functools.partial(_gcn_ktiled_kernel, tk=tk_eff,
                                       x_resident=x_res,
                                       compute_dtype=compute_dtype)
            if x_res:
                x_spec = _resident_spec((cols_p, dip), lambda i, k: (0, 0),
                                        single_buffer)
            else:
                x_spec = pl.BlockSpec((tk_eff, dip), lambda i, k: (k, 0))
            in_specs = [
                pl.BlockSpec((tm_eff, tk_eff), lambda i, k: (i, k)),       # adj
                x_spec,                                                    # x
                _resident_spec((dip, dop), lambda i, k: (0, 0), single_buffer),
            ]
            out_spec = pl.BlockSpec((tm_eff, dop), lambda i, k: (i, 0))
            scratch = [pltpu.VMEM((tm_eff, dip), jnp.float32)]
            dims = ("parallel", "arbitrary")

        return pl.pallas_call(
            kernel,
            out_shape=jax.ShapeDtypeStruct((rows_p, dop), out_dtype),
            grid_spec=pltpu.PrefetchScalarGridSpec(
                num_scalar_prefetch=0,
                grid=grid,
                in_specs=in_specs,
                out_specs=out_spec,
                scratch_shapes=scratch,
            ),
            compiler_params=pltpu.CompilerParams(
                dimension_semantics=dims,
                vmem_limit_bytes=vmem_limit,
            ),
            cost_estimate=cost,
        )(adj_p, x_p, w_p)

    try:
        out_p = _run(True)
    except Exception:
        # pl.Buffered(1) is a pure VMEM-saving hint; if this JAX/Mosaic build
        # rejects single buffering, fall back to default double buffering.
        out_p = _run(False)

    return out_p[:N, :d_out]


# ---------------------------------------------------------------------------
# Demo / correctness check
# ---------------------------------------------------------------------------

if __name__ == "__main__":
    N, D_IN, D_OUT = 256, 128, 128

    key = jax.random.PRNGKey(0)
    k_x, k_adj, k_w = jax.random.split(key, 3)

    x = jax.random.normal(k_x, (N, D_IN), dtype=jnp.float32)
    # Dense normalized-adjacency-like matrix (torch.mm in the reference also
    # treats adj as dense).
    adj = jax.nn.softmax(jax.random.normal(k_adj, (N, N), dtype=jnp.float32), axis=-1)
    weight = he_init(k_w, D_IN, D_OUT)

    # Pure-JAX reference (matches PyTorch ordering; our kernel reassociates,
    # which changes rounding order only).
    xw_ref = jnp.dot(x, weight, precision=jax.lax.Precision.HIGHEST)
    ref = jnp.tanh(jnp.dot(adj, xw_ref, precision=jax.lax.Precision.HIGHEST))

    # 1) Preferred fused path (collapsed K; x & W VMEM-resident), f32.
    out = graph_conv_sparse_forward(x, adj, weight)
    jax.block_until_ready(out)
    assert out.shape == (N, D_OUT)
    assert jnp.allclose(out, ref, atol=1e-4, rtol=1e-4), float(
        jnp.max(jnp.abs(out - ref)))

    # 2) K-tiled fallback paths (exercised explicitly at small shape).
    for p in ("ktiled_resident", "ktiled_stream"):
        out_kt = graph_conv_sparse_forward(x, adj, weight, tk=128, force_path=p)
        jax.block_until_ready(out_kt)
        assert jnp.allclose(out_kt, ref, atol=1e-4, rtol=1e-4), p

    # 3) Caller-side bf16 storage of adj / x (halves the dominant HBM stream on
    #    v5e/v6e; fp8 adj on v7x would quarter it).  Accumulation & epilogue
    #    stay f32.
    out_bf16 = graph_conv_sparse_forward(
        x.astype(jnp.bfloat16), adj.astype(jnp.bfloat16), weight,
        compute_dtype=jnp.bfloat16, out_dtype=jnp.float32)
    jax.block_until_ready(out_bf16)
    assert jnp.allclose(out_bf16, ref, atol=5e-2, rtol=5e-2)

    print("KERNEL_OK")
</pallas_src>

<mosaic_0001>
module attributes {stable_mosaic.version = 11 : i64} {
  func.func @_gcn_rowpanel_kernel(%arg0: i32, %arg1: memref<128x256xf32, #tpu.memory_space<vmem>>, %arg2: memref<256x128xf32, #tpu.memory_space<vmem>>, %arg3: memref<128x128xf32, #tpu.memory_space<vmem>>, %arg4: memref<128x128xf32, #tpu.memory_space<vmem>>) attributes {dimension_semantics = [#tpu.dimension_semantics<parallel>], iteration_bounds = array<i64: 2>, scalar_prefetch = 0 : i64, scratch_operands = 0 : i64, tpu.core_type = #tpu.core_type<tc>, window_params = [{transform_indices = @transform_0, window_bounds = array<i64: 128, 256>}, {pipeline_mode = #tpu.pipeline_mode<synchronous>, transform_indices = @transform_1, window_bounds = array<i64: 256, 128>}, {pipeline_mode = #tpu.pipeline_mode<synchronous>, transform_indices = @transform_2, window_bounds = array<i64: 128, 128>}, {transform_indices = @transform_3, window_bounds = array<i64: 128, 128>}]} {
    %c0 = arith.constant 0 : index
    %c0_0 = arith.constant 0 : index
    %0 = vector.load %arg1[%c0, %c0_0] : memref<128x256xf32, #tpu.memory_space<vmem>>, vector<128x256xf32>
    %c0_1 = arith.constant 0 : index
    %c0_2 = arith.constant 0 : index
    %1 = vector.load %arg2[%c0_1, %c0_2] : memref<256x128xf32, #tpu.memory_space<vmem>>, vector<256x128xf32>
    %cst = arith.constant dense<0.000000e+00> : vector<128x128xf32>
    %2 = tpu.matmul %0, %1, %cst {dimension_numbers = #tpu.dot_dimension_numbers<[1], [0], [0], [1], [0, 0, 1, 1], [], []>} : vector<128x256xf32>, vector<256x128xf32>, vector<128x128xf32> -> vector<128x128xf32>
    %c0_3 = arith.constant 0 : index
    %c0_4 = arith.constant 0 : index
    %3 = vector.load %arg3[%c0_3, %c0_4] : memref<128x128xf32, #tpu.memory_space<vmem>>, vector<128x128xf32>
    %cst_5 = arith.constant dense<0.000000e+00> : vector<128x128xf32>
    %4 = tpu.matmul %2, %3, %cst_5 {dimension_numbers = #tpu.dot_dimension_numbers<[1], [0], [0], [1], [0, 0, 1, 1], [], []>} : vector<128x128xf32>, vector<128x128xf32>, vector<128x128xf32> -> vector<128x128xf32>
    %5 = math.tanh %4 : vector<128x128xf32>
    %c0_6 = arith.constant 0 : index
    %c0_7 = arith.constant 0 : index
    %6 = vector.load %arg4[%c0_6, %c0_7] : memref<128x128xf32, #tpu.memory_space<vmem>>, vector<128x128xf32>
    tpu.vector_store %arg4[%c0_6, %c0_7], %5 {strides = array<i32>} : memref<128x128xf32, #tpu.memory_space<vmem>>, vector<128x128xf32>,
    return
  }
  func.func @transform_0(%arg0: i32) -> (i32, i32) {
    %c0_i32 = arith.constant 0 : i32
    %c0_i32_0 = arith.constant 0 : i32
    return %arg0, %c0_i32 : i32, i32
  }
  func.func @transform_1(%arg0: i32) -> (i32, i32) {
    %c0_i32 = arith.constant 0 : i32
    %c0_i32_0 = arith.constant 0 : i32
    %c0_i32_1 = arith.constant 0 : i32
    return %c0_i32, %c0_i32_0 : i32, i32
  }
  func.func @transform_2(%arg0: i32) -> (i32, i32) {
    %c0_i32 = arith.constant 0 : i32
    %c0_i32_0 = arith.constant 0 : i32
    %c0_i32_1 = arith.constant 0 : i32
    return %c0_i32, %c0_i32_0 : i32, i32
  }
  func.func @transform_3(%arg0: i32) -> (i32, i32) {
    %c0_i32 = arith.constant 0 : i32
    %c0_i32_0 = arith.constant 0 : i32
    return %arg0, %c0_i32 : i32, i32
  }
}

module attributes {stable_mosaic.version = 11 : i64} {
  func.func @_gcn_rowpanel_kernel(%arg0: i32, %arg1: memref<128x256xf32, #tpu.memory_space<vmem>>, %arg2: memref<256x128xf32, #tpu.memory_space<vmem>>, %arg3: memref<128x128xf32, #tpu.memory_space<vmem>>, %arg4: memref<128x128xf32, #tpu.memory_space<vmem>>) attributes {dimension_semantics = [#tpu.dimension_semantics<parallel>], iteration_bounds = array<i64: 2>, scalar_prefetch = 0 : i64, scratch_operands = 0 : i64, tpu.core_type = #tpu.core_type<tc>, window_params = [{transform_indices = @transform_0, window_bounds = array<i64: 128, 256>}, {pipeline_mode = #tpu.pipeline_mode<synchronous>, transform_indices = @transform_1, window_bounds = array<i64: 256, 128>}, {pipeline_mode = #tpu.pipeline_mode<synchronous>, transform_indices = @transform_2, window_bounds = array<i64: 128, 128>}, {transform_indices = @transform_3, window_bounds = array<i64: 128, 128>}]} {
    %c0 = arith.constant 0 : index
    %c0_0 = arith.constant 0 : index
    %0 = vector.load %arg1[%c0, %c0_0] : memref<128x256xf32, #tpu.memory_space<vmem>>, vector<128x256xf32>
    %c0_1 = arith.constant 0 : index
    %c0_2 = arith.constant 0 : index
    %1 = vector.load %arg2[%c0_1, %c0_2] : memref<256x128xf32, #tpu.memory_space<vmem>>, vector<256x128xf32>
    %cst = arith.constant dense<0.000000e+00> : vector<128x128xf32>
    %2 = tpu.matmul %0, %1, %cst {dimension_numbers = #tpu.dot_dimension_numbers<[1], [0], [0], [1], [0, 0, 1, 1], [], []>} : vector<128x256xf32>, vector<256x128xf32>, vector<128x128xf32> -> vector<128x128xf32>
    %c0_3 = arith.constant 0 : index
    %c0_4 = arith.constant 0 : index
    %3 = vector.load %arg3[%c0_3, %c0_4] : memref<128x128xf32, #tpu.memory_space<vmem>>, vector<128x128xf32>
    %cst_5 = arith.constant dense<0.000000e+00> : vector<128x128xf32>
    %4 = tpu.matmul %2, %3, %cst_5 {dimension_numbers = #tpu.dot_dimension_numbers<[1], [0], [0], [1], [0, 0, 1, 1], [], []>} : vector<128x128xf32>, vector<128x128xf32>, vector<128x128xf32> -> vector<128x128xf32>
    %5 = math.tanh %4 : vector<128x128xf32>
    %c0_6 = arith.constant 0 : index
    %c0_7 = arith.constant 0 : index
    %6 = vector.load %arg4[%c0_6, %c0_7] : memref<128x128xf32, #tpu.memory_space<vmem>>, vector<128x128xf32>
    tpu.vector_store %arg4[%c0_6, %c0_7], %5 {strides = array<i32>} : memref<128x128xf32, #tpu.memory_space<vmem>>, vector<128x128xf32>,
    return
  }
  func.func @transform_0(%arg0: i32) -> (i32, i32) {
    %c0_i32 = arith.constant 0 : i32
    %c0_i32_0 = arith.constant 0 : i32
    return %arg0, %c0_i32 : i32, i32
  }
  func.func @transform_1(%arg0: i32) -> (i32, i32) {
    %c0_i32 = arith.constant 0 : i32
    %c0_i32_0 = arith.constant 0 : i32
    %c0_i32_1 = arith.constant 0 : i32
    return %c0_i32, %c0_i32_0 : i32, i32
  }
  func.func @transform_2(%arg0: i32) -> (i32, i32) {
    %c0_i32 = arith.constant 0 : i32
    %c0_i32_0 = arith.constant 0 : i32
    %c0_i32_1 = arith.constant 0 : i32
    return %c0_i32, %c0_i32_0 : i32, i32
  }
  func.func @transform_3(%arg0: i32) -> (i32, i32) {
    %c0_i32 = arith.constant 0 : i32
    %c0_i32_0 = arith.constant 0 : i32
    return %arg0, %c0_i32 : i32, i32
  }
}

</mosaic_0001>

<bundles_post_ra>
// kernel: tpu_custom_call.1
= control target key start
LH: loop header
LB: loop body
LE: loop exit
PB: predicated region body
PF: predicated region fallthrough
CT: control target
= control target key end

     0   :  { %8 = vsyncpa [#allocation3], 0  ;;  %s1564_s0 = inlined_call_operand.hbm [shape: f32[256,256], index: 0, kind: input, shape index: {}]   ;;  %s1565_s1 = inlined_call_operand.hbm [shape: f32[256,128], index: 1, kind: input, shape index: {}]   ;;  %s1566_s2 = inlined_call_operand.hbm [shape: f32[128,128], index: 2, kind: input, shape index: {}]   ;;  %s1567_s3 = inlined_call_operand.hbm [shape: f32[256,128], index: 3, kind: output, shape index: {}]  }
   0x1   :  { %10 = vsyncpa [#allocation3 + $0x1], 0 }
   0x2   :  { %11 = vsyncpa [#allocation6], 0 }
   0x3   :  { %12 = vsyncpa [#allocation4], 0 }
   0x4   :  { %14 = vsyncpa [#allocation4 + $0x1], 0  ;;  %s1276_s12 = smov 0   ;;  %s1278_s13 = smov 0  }
   0x5   :  { %s1280_s14 = smov 0   ;;  %s1282_s15 = smov 0  }
   0x6 LB: > { %s1297_s16 = sadd.s32 4294967295, %s1244_s15   ;;  %s729_s17 = sadd.s32 4294967294, %s1244_s15   ;;  %s1244_s15 = sphi %s1282_s15, %s1587_s15   ;;  %s1240_s14 = sphi %s1280_s14, %s1586_s14   ;;  %s1236_s13 = sphi %s1278_s13, %s1585_s13   ;;  %s1232_s12 = sphi %s1276_s12, %s1584_s12  }
   0x7   : > { %p40_p0 = scmp.ne.s32.totalorder %s1236_s13, %s1232_s12  ;;  %p1568_p1 = scmp.eq.s32.totalorder %s1297_s16, 0 }
   0x8   : > { %p112_p3 = scmp.eq.s32.totalorder %s729_s17, 1  ;;  %p730_p5 = scmp.ge.s32.totalorder %s1244_s15, 1 }
   0x9   : > { %p1306_p4 = por %p1568_p1, %p40_p0  ;;  %p119_p7 = scmp.lt.s32.totalorder %s1244_s15, 3 }
   0xa   : > { %p1311_p6 = por %p112_p3, %p40_p0  ;;  %s1246_s21 = smov [#allocation5]  }
   0xb   : > { %s1571_s18 = scalar_select %p1306_p4, 1, 0 }
   0xc   : > { %s1572_s19 = scalar_select %p1311_p6, 1, 0 }
   0xd   : > { %p1316_p8 = pnand %p730_p5, %p119_p7  ;;  %s131_s22 = sshll.u32 %s1246_s21, 4  ;;  %s1320_s22 = int_to_ptr.vmem [resolvable:$true] %s131_s22 }
   0xe   : > { %s1247_s24 = smov [#allocation7]   ;;  %s1088_s28 = scalar_lea.hbm %s1565_s1, 4096 }
   0xf   : > { %p995_p9 = pneg %p1316_p8  ;;  %s144_s25 = sshll.u32 %s1247_s24, 4  ;;  %s1331_s25 = int_to_ptr.vmem [resolvable:$true] %s144_s25 }
  0x10   : > { %p1089_p12 = scmp.ne.s32.totalorder %s1565_s1, %s1088_s28  ;;  %p1095_p5 = scmp.lt.u32.totalorder %s1088_s28, %s1565_s1 }
  0x11   : > { %p1327_p11 = pnand %p995_p9, %p1568_p1 }
  0x13   : > { %p1090_p13 = pneg %p1327_p11 }
  0x15   : > { %p1091_p0 = pnand %p1090_p13, %p1089_p12 }
  0x17   : > { %p1092_p3 = pneg %p1091_p0 }
  0x19   : > { %p1097_p7 = pnand %p1095_p5, %p1092_p3 }
  0x1b   : > { %1100 = shalt.err (!%p1097_p7)
}
  0x1c   : > { %s1101_s6 = scalar_lea.vmem %s1320_s22, 4096  ;;  %p1109_p2 = scmp.lt.s32.totalorder %s1320_s22, %s1320_s22 }
  0x1d   : > { %p1102_p9 = scmp.ne.s32.totalorder %s1320_s22, %s1101_s6  ;;  %p1110_p12 = scmp.lt.s32.totalorder %s1101_s6, %s1101_s6 }
  0x1f   : > { %p1104_p10 = pnand %p1102_p9, %p1090_p13  ;;  %p1111_p0 = por %p1110_p12, %p1109_p2 }
  0x21   : > { %p1105_p1 = pneg %p1104_p10 }
  0x23   : > { %p1112_p6 = pnand %p1111_p0, %p1105_p1 }
  0x25   : > { %1115 = shalt.err (!%p1112_p6)
}
  0x26   : > { %s1248_s7 = smov 128   ;;  %s1249_s8 = smov 8  }
  0x27   : > { %998 = dma.hbm_to_vmem [thread:$0]  (!%p1327_p11), %s1565_s1, 4096, %s1320_s22, [#allocation6], %s1248_s7, %s1248_s7, %s1249_s8  }
  0x28   : > { %s1116_s21 = scalar_lea.hbm %s1566_s2, 2048 }
  0x29   : > { %p1117_p2 = scmp.ne.s32.totalorder %s1566_s2, %s1116_s21  ;;  %p1123_p10 = scmp.lt.u32.totalorder %s1116_s21, %s1566_s2 }
  0x2b   : > { %p1119_p1 = pnand %p1117_p2, %p1090_p13 }
  0x2d   : > { %p1120_p6 = pneg %p1119_p1 }
  0x2f   : > { %p1125_p3 = pnand %p1123_p10, %p1120_p6 }
  0x31   : > { %1128 = shalt.err (!%p1125_p3)
}
  0x32   : > { %s1129_s22 = scalar_lea.vmem %s1331_s25, 2048  ;;  %p1137_p12 = scmp.lt.s32.totalorder %s1331_s25, %s1331_s25 }
  0x33   : > { %p1130_p5 = scmp.ne.s32.totalorder %s1331_s25, %s1129_s22  ;;  %p1138_p0 = scmp.lt.s32.totalorder %s1129_s22, %s1129_s22 }
  0x35   : > { %p1132_p7 = pnand %p1130_p5, %p1090_p13  ;;  %p1139_p2 = por %p1138_p0, %p1137_p12 }
  0x37   : > { %p1133_p9 = pneg %p1132_p7 }
  0x39   : > { %p1140_p1 = pnand %p1139_p2, %p1133_p9 }
  0x3b   : > { %1143 = shalt.err (!%p1140_p1)
}
  0x3c   : > { %1001 = dma.hbm_to_vmem [thread:$0]  (!%p1327_p11), %s1566_s2, 2048, %s1331_s25, [#allocation6], %s1248_s7, %s1248_s7, %s1249_s8  }
  0x3d   : > { %s1386_s4 = sadd.s32 1, %s1244_s15   ;;  %s27_s23 = sadd.s32 1, %s1240_s14 }
  0x3e   : > { %s24_s5 = ssub.s32 %s1244_s15, %s1386_s4  ;;  %p34_p13 = scmp.ne.s32.totalorder %s1240_s14, %s1236_s13 }
  0x3f   : > { %p25_p6 = scmp.eq.s32.totalorder %s24_s5, 0  ;;  %p35_p10 = scmp.eq.s32.totalorder %s1244_s15, 0 }
  0x40   : > { %p1575_p3 = scmp.eq.s32.totalorder %s1297_s16, 1  ;;  %p1012_p7 = scmp.lt.s32.totalorder %s1244_s15, 2 }
  0x41   : > { %s1402_s9 = scalar_select %p25_p6, %s1240_s14, %s27_s23  }
  0x42   : > { %p1396_p5 = por %p1575_p3, %p34_p13  ;;  %p36_p9 = por %p35_p10, %p34_p13 }
  0x43   : > { %s158_s10 = sand.u32 1, %s1240_s14   ;;  %s749_s25 = sshll.u32 %s1244_s15, 12 }
  0x44   : > { %s1576_s6 = scalar_select %p1396_p5, 1, 0 }
  0x45   : > { %s734_s11 = sshll.u32 %s158_s10, 8  ;;  %s1409_s17 = scalar_lea.hbm %s1564_s0, %s749_s25 }
  0x46   : > { %s162_s21 = scalar_lea.vmem [#allocation2], %s734_s11  ;;  %p1413_p11 = pnand %p1012_p7, %p36_p9 }
  0x47   : > { %s170_s24 = sshll.u32 %s162_s21, 4  ;;  %s1417_s27 = scalar_lea.sflag [#allocation3], %s158_s10  ;;  %s1411_s24 = int_to_ptr.vmem [resolvable:$true] %s170_s24 }
  0x48   : > { %s1144_s28 = scalar_lea.hbm %s1409_s17, 4096  ;;  %p1146_p0 = pneg %p1413_p11 }
  0x49   : > { %p1145_p12 = scmp.ne.s32.totalorder %s1409_s17, %s1144_s28  ;;  %s1149_s30 = scalar_lea.hbm %s1564_s0, 8192 }
  0x4a   : > { %p1150_p13 = scmp.lt.u32.totalorder %s1409_s17, %s1564_s0  ;;  %p1151_p6 = scmp.lt.u32.totalorder %s1149_s30, %s1144_s28 }
  0x4b   : > { %p1147_p2 = pnand %p1146_p0, %p1145_p12  ;;  %p1153_p3 = scmp.lt.u32.totalorder %s1144_s28, %s1409_s17 }
  0x4c   : > { %p1152_p10 = por %p1151_p6, %p1150_p13 }
  0x4d   : > { %p1148_p1 = pneg %p1147_p2 }
  0x4e   : > { %p1154_p7 = por %p1153_p3, %p1152_p10 }
  0x50   : > { %p1155_p9 = pnand %p1154_p7, %p1148_p1 }
  0x52   : > { %1158 = shalt.err (!%p1155_p9)
}
  0x53   : > { %s1159_s10 = scalar_lea.vmem %s1411_s24, 4096  ;;  %s1250_s11 = smov [#allocation2]  }
  0x54   : > { %p1160_p12 = scmp.ne.s32.totalorder %s1411_s24, %s1159_s10  ;;  %s1164_s25 = sshll.u32 %s1250_s11, 4  ;;  %s1165_s25 = int_to_ptr.vmem [resolvable:$false] %s1164_s25 }
  0x55   : > { %s1166_s7 = scalar_lea.vmem %s1165_s25, 8192  ;;  %p1167_p4 = scmp.lt.s32.totalorder %s1411_s24, %s1165_s25 }
  0x56   : > { %p1162_p2 = pnand %p1160_p12, %p1146_p0  ;;  %p1168_p13 = scmp.lt.s32.totalorder %s1166_s7, %s1159_s10 }
  0x58   : > { %p1163_p5 = pneg %p1162_p2  ;;  %p1169_p6 = por %p1168_p13, %p1167_p4 }
  0x5a   : > { %p1170_p10 = pnand %p1169_p6, %p1163_p5 }
  0x5c   : > { %1173 = shalt.err (!%p1170_p10)
}
  0x5d   : > { %s1251_s8 = smov 256   ;;  %s1252_s21 = smov 16  }
  0x5e   : > { %1005 = dma.hbm_to_vmem [thread:$0]  (!%p1413_p11), %s1409_s17, 4096, %s1411_s24, %s1417_s27, %s1251_s8, %s1251_s8, %s1252_s21  }
  0x5f   : > { %182 = sbr.rel (%p1316_p8) target bundleno = 655 (0x28f), region = 32  ;;  %s1448_s28 = sand.u32 (!%p1316_p8), 1, %s1236_s13  }
  0x60   : > { %s739_s22 = sshll.u32 (!%p1316_p8), %s1448_s28, 8  ;;  %s185_s29 = scalar_lea.sflag (!%p1316_p8), [#allocation3], %s1448_s28 }
  0x61   : > { %s1452_s30 = scalar_lea.vmem (!%p1316_p8), [#allocation2], %s739_s22  ;;  %p1578_p4 = scmp.ne.s32.totalorder (!%p1316_p8), %s1571_s18, 0 }
  0x66   : > { %1219 = dma.done.wait (%p1578_p4), %s185_s29, 4096  }
  0x67   : > { %1221 = vsyncadd (%p1578_p4), %s185_s29, 4294963200  ;;  %p1579_p5 = scmp.eq.s32.totalorder %s1297_s16, 0 }
  0x69   : > { %1223 = dma.done.wait (%p1579_p5), [#allocation6], 6144   ;;  %p1580_p8 = pmov %p1579_p5 }
  0x6a   : > { %v269_v0 = vld [vmem:[#allocation5 + $0x80] sm:$0xff]  ;;  %v270_v1 = vld [vmem:[#allocation5 + $0x88] sm:$0xff]  ;;  %v271_v5 = vld [vmem:[#allocation5 + $0x90] sm:$0xff]  ;;  %s742_s18 = sshll.u32 %s1448_s28, 7  ;;  %s750_s17 = sshll.u32 %s1297_s16, 11 }
  0x6b   : > { %1225 = vsyncadd (%p1580_p8), [#allocation6], 4294961152  ;;  %v253_v2 = vld [vmem:[#allocation5] sm:$0xff]  ;;  %v919_v3 = vpack.c.bf16 %v270_v1, %v269_v0  ;;  %v254_v4 = vld [vmem:[#allocation5 + $0x8] sm:$0xff]  ;;  %s1495_s20 = scalar_lea.vmem [#allocation8], %s742_s18  ;;  %s1516_s23 = scalar_lea.hbm %s1567_s3, %s750_s17 }
  0x6c   : > { %v272_v6 = vld [vmem:[#allocation5 + $0x98] sm:$0xff]  ;;  %v921_v7 = vpack.c.bf16 %v254_v4, %v253_v2  ;;  %v255_v9 = vld [vmem:[#allocation5 + $0x10] sm:$0xff]  ;;  %v273_v11 = vld [vmem:[#allocation5 + $0xa0] sm:$0xff]  ;;  %s637_s24 = sshll.u32 %s1495_s20, 4  ;;  %s624_s5 = scalar_lea.sflag [#allocation4], %s1448_s28  ;;  %s1518_s24 = int_to_ptr.vmem [resolvable:$true] %s637_s24 }
  0x6d   : > { %v923_v8 = vpack.c.bf16 %v272_v6, %v271_v5  ;;  %v256_v10 = vld [vmem:[#allocation5 + $0x18] sm:$0xff]  ;;  %920 = vmatprep.subr.bf16.mxu0 %v919_v3  ;;  %v274_v12 = vld [vmem:[#allocation5 + $0xa8] sm:$0xff]  ;;  %v257_v15 = vld [vmem:[#allocation5 + $0x20] sm:$0xff]  ;;  %s1174_s10 = scalar_lea.vmem %s1518_s24, 2048  ;;  %p1581_p0 = scmp.ne.s32.totalorder %s1576_s6, 0 }
  0x6e   : > { %922 = vmatpush3.bf16.msra.mxu0 %v921_v7  ;;  %v925_v13 = vpack.c.bf16 %v256_v10, %v255_v9  ;;  %v927_v14 = vpack.c.bf16 %v274_v12, %v273_v11  ;;  %v258_v16 = vld [vmem:[#allocation5 + $0x28] sm:$0xff]  ;;  %v275_v17 = vld [vmem:[#allocation5 + $0xb0] sm:$0xff]  ;;  %v276_v18 = vld [vmem:[#allocation5 + $0xb8] sm:$0xff]  ;;  %p1175_p11 = scmp.ne.s32.totalorder %s1518_s24, %s1174_s10  ;;  %s1253_s16 = smov [#allocation8]  }
  0x6f   : > { %924 = vmatprep.subr.bf16.mxu0 %v923_v8  ;;  %v929_v19 = vpack.c.bf16 %v258_v16, %v257_v15  ;;  %v931_v20 = vpack.c.bf16 %v276_v18, %v275_v17  ;;  %v259_v21 = vld [vmem:[#allocation5 + $0x30] sm:$0xff]  ;;  %v260_v22 = vld [vmem:[#allocation5 + $0x38] sm:$0xff]  ;;  %v277_v23 = vld [vmem:[#allocation5 + $0xc0] sm:$0xff]  ;;  %s1178_s11 = sshll.u32 %s1253_s16, 4  ;;  %s1179_s11 = int_to_ptr.vmem [resolvable:$false] %s1178_s11 }
  0x70   : > { %v278_v24 = vld [vmem:[#allocation5 + $0xc8] sm:$0xff]  ;;  %v933_v26 = vpack.c.bf16 %v260_v22, %v259_v21  ;;  %v261_v28 = vld [vmem:[#allocation5 + $0x40] sm:$0xff]  ;;  %v279_v30 = vld [vmem:[#allocation5 + $0xd0] sm:$0xff]  ;;  %p1176_p1 = pnand %p1175_p11, %p1581_p0  ;;  %s1180_s25 = scalar_lea.vmem %s1179_s11, 4096 }
  0x71   : > { %v222_v25 = vld [vmem:[%s1452_s30 + $0x8] sm:$0xff]  ;;  %v935_v27 = vpack.c.bf16 %v278_v24, %v277_v23  ;;  %v280_v31 = vld [vmem:[#allocation5 + $0xd8] sm:$0xff]  ;;  %v263_v34 = vld [vmem:[#allocation5 + $0x50] sm:$0xff]  ;;  %p1181_p7 = scmp.lt.s32.totalorder %s1518_s24, %s1179_s11  ;;  %p1182_p9 = scmp.lt.s32.totalorder %s1180_s25, %s1174_s10 }
  0x72   : > { %926 = vmatpush3.bf16.msra.mxu0 %v925_v13  ;;  %349 = vmatprep.mubr.f32.mxu0 %v222_v25  ;;  %v262_v29 = vld [vmem:[#allocation5 + $0x48] sm:$0xff]  ;;  %v939_v33 = vpack.c.bf16 %v280_v31, %v279_v30  ;;  %v264_v35 = vld [vmem:[#allocation5 + $0x58] sm:$0xff]  ;;  %v281_v36 = vld [vmem:[#allocation5 + $0xe0] sm:$0xff]  ;;  %p1177_p3 = pneg %p1176_p1 }
  0x73   : > { %928 = vmatprep.subr.bf16.mxu0 %v927_v14  ;;  %v937_v32 = vpack.c.bf16 %v262_v29, %v261_v28  ;;  %v282_v37 = vld [vmem:[#allocation5 + $0xe8] sm:$0xff]  ;;  %v941_v38 = vpack.c.bf16 %v264_v35, %v263_v34  ;;  %v265_v39 = vld [vmem:[#allocation5 + $0x60] sm:$0xff]  ;;  %v283_v42 = vld [vmem:[#allocation5 + $0xf0] sm:$0xff]  ;;  %p1183_p12 = por %p1182_p9, %p1181_p7 }
  0x74   : > { %v266_v40 = vld [vmem:[#allocation5 + $0x68] sm:$0xff]  ;;  %v943_v41 = vpack.c.bf16 %v282_v37, %v281_v36  ;;  %v430_v43 = vld [vmem:[#allocation7] sm:$0xff]  ;;  %v284_v45 = vld [vmem:[#allocation5 + $0xf8] sm:$0xff] }
  0x75   : > { %v431_v44 = vld [vmem:[#allocation7 + $0x8] sm:$0xff]  ;;  %v432_v47 = vld [vmem:[#allocation7 + $0x10] sm:$0xff]  ;;  %v433_v48 = vld [vmem:[#allocation7 + $0x18] sm:$0xff]  ;;  %v945_v52 = vpack.c.bf16 %v266_v40, %v265_v39  ;;  %v947_v53 = vpack.c.bf16 %v284_v45, %v283_v42  ;;  %p1184_p2 = pnand %p1183_p12, %p1177_p3 }
  0x76   : > { %930 = vmatpush3.bf16.msra.mxu0 %v929_v19  ;;  %v951_v46 = vpack.c.bf16 %v431_v44, %v430_v43  ;;  %v955_v49 = vpack.c.bf16 %v433_v48, %v432_v47  ;;  %v434_v50 = vld [vmem:[#allocation7 + $0x20] sm:$0xff]  ;;  %v435_v51 = vld [vmem:[#allocation7 + $0x28] sm:$0xff]  ;;  %v267_v54 = vld [vmem:[#allocation5 + $0x70] sm:$0xff] }
  0x77   : > { %932 = vmatprep.subr.bf16.mxu0 %v931_v20  ;;  %v268_v55 = vld [vmem:[#allocation5 + $0x78] sm:$0xff]  ;;  %v959_v56 = vpack.c.bf16 %v435_v51, %v434_v50  ;;  %v436_v57 = vld [vmem:[#allocation7 + $0x30] sm:$0xff]  ;;  %v438_v61 = vld [vmem:[#allocation7 + $0x40] sm:$0xff] }
  0x78   : > { %952 = vmatprep.subr.bf16.mxu1 %v951_v46  ;;  %v437_v58 = vld [vmem:[#allocation7 + $0x38] sm:$0xff]  ;;  %v949_v59 = vpack.c.bf16 %v268_v55, %v267_v54  ;;  %v439_v62 = vld [vmem:[#allocation7 + $0x48] sm:$0xff]  ;;  %v221_v63 = vld [vmem:[%s1452_s30] sm:$0xff] }
  0x79   : > { %954 = vmatpush3.bf16.msra.mxu1 %v951_v46  ;;  %v963_v60 = vpack.c.bf16 %v437_v58, %v436_v57  ;;  %v224_v0 = vld [vmem:[%s1452_s30 + $0x18] sm:$0xff]  ;;  %v967_v1 = vpack.c.bf16 %v439_v62, %v438_v61  ;;  %v440_v2 = vld [vmem:[#allocation7 + $0x50] sm:$0xff]  ;;  %v226_v5 = vld [vmem:[%s1452_s30 + $0x28] sm:$0xff] }
  0x7a   : > { %934 = vmatpush3.bf16.msra.mxu0 %v933_v26  ;;  %956 = vmatprep.subr.bf16.mxu1 %v955_v49  ;;  %v441_v3 = vld [vmem:[#allocation7 + $0x58] sm:$0xff]  ;;  %v223_v4 = vld [vmem:[%s1452_s30 + $0x10] sm:$0xff]  ;;  %v225_v7 = vld [vmem:[%s1452_s30 + $0x20] sm:$0xff] }
  0x7b   : > { %936 = vmatprep.subr.bf16.mxu0 %v935_v27  ;;  %v971_v6 = vpack.c.bf16 %v441_v3, %v440_v2  ;;  %v228_v8 = vld [vmem:[%s1452_s30 + $0x38] sm:$0xff]  ;;  %v227_v9 = vld [vmem:[%s1452_s30 + $0x30] sm:$0xff]  ;;  %v230_v10 = vld [vmem:[%s1452_s30 + $0x48] sm:$0xff] }
  0x7c   : > { %v229_v11 = vld [vmem:[%s1452_s30 + $0x40] sm:$0xff]  ;;  %v232_v12 = vld [vmem:[%s1452_s30 + $0x58] sm:$0xff]  ;;  %v231_v13 = vld [vmem:[%s1452_s30 + $0x50] sm:$0xff] }
  0x7d   : > { %958 = vmatpush3.bf16.msra.mxu1 %v955_v49  ;;  %v234_v14 = vld [vmem:[%s1452_s30 + $0x68] sm:$0xff]  ;;  %v233_v15 = vld [vmem:[%s1452_s30 + $0x60] sm:$0xff]  ;;  %v236_v16 = vld [vmem:[%s1452_s30 + $0x78] sm:$0xff] }
  0x7e   : > { %938 = vmatpush3.bf16.msra.mxu0 %v937_v32  ;;  %960 = vmatprep.subr.bf16.mxu1 %v959_v56  ;;  %v235_v17 = vld [vmem:[%s1452_s30 + $0x70] sm:$0xff]  ;;  %v238_v18 = vld [vmem:[%s1452_s30 + $0x88] sm:$0xff]  ;;  %v237_v19 = vld [vmem:[%s1452_s30 + $0x80] sm:$0xff] }
  0x7f   : > { %940 = vmatprep.subr.bf16.mxu0 %v939_v33  ;;  %v240_v20 = vld [vmem:[%s1452_s30 + $0x98] sm:$0xff]  ;;  %v239_v21 = vld [vmem:[%s1452_s30 + $0x90] sm:$0xff]  ;;  %v242_v22 = vld [vmem:[%s1452_s30 + $0xa8] sm:$0xff] }
  0x80   : > { %v241_v23 = vld [vmem:[%s1452_s30 + $0xa0] sm:$0xff]  ;;  %v244_v24 = vld [vmem:[%s1452_s30 + $0xb8] sm:$0xff]  ;;  %v243_v25 = vld [vmem:[%s1452_s30 + $0xb0] sm:$0xff] }
  0x81   : > { %962 = vmatpush3.bf16.msra.mxu1 %v959_v56  ;;  %v246_v26 = vld [vmem:[%s1452_s30 + $0xc8] sm:$0xff]  ;;  %v245_v27 = vld [vmem:[%s1452_s30 + $0xc0] sm:$0xff]  ;;  %v248_v28 = vld [vmem:[%s1452_s30 + $0xd8] sm:$0xff] }
  0x82   : > { %942 = vmatpush3.bf16.msra.mxu0 %v941_v38  ;;  %964 = vmatprep.subr.bf16.mxu1 %v963_v60  ;;  %v247_v29 = vld [vmem:[%s1452_s30 + $0xd0] sm:$0xff]  ;;  %v250_v30 = vld [vmem:[%s1452_s30 + $0xe8] sm:$0xff]  ;;  %v249_v31 = vld [vmem:[%s1452_s30 + $0xe0] sm:$0xff] }
  0x83   : > { %944 = vmatprep.subr.bf16.mxu0 %v943_v41  ;;  %v252_v32 = vld [vmem:[%s1452_s30 + $0xf8] sm:$0xff]  ;;  %v251_v33 = vld [vmem:[%s1452_s30 + $0xf0] sm:$0xff]  ;;  %v442_v34 = vld [vmem:[#allocation7 + $0x60] sm:$0xff] }
  0x84   : > { %v443_v35 = vld [vmem:[#allocation7 + $0x68] sm:$0xff]  ;;  %v444_v37 = vld [vmem:[#allocation7 + $0x70] sm:$0xff]  ;;  %v445_v38 = vld [vmem:[#allocation7 + $0x78] sm:$0xff] }
  0x85   : > { %966 = vmatpush3.bf16.msra.mxu1 %v963_v60  ;;  %v975_v36 = vpack.c.bf16 %v443_v35, %v442_v34  ;;  %v979_v39 = vpack.c.bf16 %v445_v38, %v444_v37 }
  0x86   : > { %946 = vmatpush3.bf16.msra.mxu0 %v945_v52  ;;  %968 = vmatprep.subr.bf16.mxu1 %v967_v1 }
  0x87   : > { %948 = vmatprep.subr.bf16.mxu0 %v947_v53 }
  0x89   : > { %970 = vmatpush3.bf16.msra.mxu1 %v967_v1 }
  0x8a   : > { %950 = vmatpush3.bf16.msra.mxu0 %v949_v59  ;;  %972 = vmatprep.subr.bf16.mxu1 %v971_v6 }
  0x8d   : > { %350 = vmatmul.mubr.f32.vlgmr.msra.gmra.mrb[0].mxu0 %v221_v63  ;;  %974 = vmatpush3.bf16.msra.mxu1 %v971_v6 }
  0x8e   : > { %354 = vmatprep.mubr.f32.mxu0 %v224_v0  ;;  %976 = vmatprep.subr.bf16.mxu1 %v975_v36 }
  0x91   : > { %355 = vmatmul.mubr.f32.gmra.mrb[2].mxu0 %v223_v4  ;;  %978 = vmatpush3.bf16.msra.mxu1 %v975_v36 }
  0x92   : > { %359 = vmatprep.mubr.f32.mxu0 %v226_v5  ;;  %980 = vmatprep.subr.bf16.mxu1 %v979_v39 }
  0x95   : > { %360 = vmatmul.mubr.f32.gmra.mrb[4].mxu0 %v225_v7  ;;  %982 = vmatpush3.bf16.msra.mxu1 %v979_v39 }
  0x96   : > { %364 = vmatprep.mubr.f32.mxu0 %v228_v8 }
  0x99   : > { %365 = vmatmul.mubr.f32.gmra.mrb[6].mxu0 %v227_v9 }
  0x9a   : > { %369 = vmatprep.mubr.f32.mxu0 %v230_v10 }
  0x9d   : > { %370 = vmatmul.mubr.f32.gmra.mrb[8].mxu0 %v229_v11 }
  0x9e   : > { %374 = vmatprep.mubr.f32.mxu0 %v232_v12 }
  0xa1   : > { %375 = vmatmul.mubr.f32.gmra.mrb[10].mxu0 %v231_v13 }
  0xa2   : > { %379 = vmatprep.mubr.f32.mxu0 %v234_v14 }
  0xa5   : > { %380 = vmatmul.mubr.f32.gmra.mrb[12].mxu0 %v233_v15 }
  0xa6   : > { %384 = vmatprep.mubr.f32.mxu0 %v236_v16 }
  0xa9   : > { %385 = vmatmul.mubr.f32.gmra.mrb[14].mxu0 %v235_v17 }
  0xaa   : > { %389 = vmatprep.mubr.f32.mxu0 %v238_v18 }
  0xad   : > { %390 = vmatmul.mubr.f32.gmra.mrb[16].mxu0 %v237_v19 }
  0xae   : > { %394 = vmatprep.mubr.f32.mxu0 %v240_v20 }
  0xb1   : > { %395 = vmatmul.mubr.f32.gmra.mrb[18].mxu0 %v239_v21 }
  0xb2   : > { %399 = vmatprep.mubr.f32.mxu0 %v242_v22 }
  0xb5   : > { %400 = vmatmul.mubr.f32.gmra.mrb[20].mxu0 %v241_v23 }
  0xb6   : > { %404 = vmatprep.mubr.f32.mxu0 %v244_v24 }
  0xb9   : > { %405 = vmatmul.mubr.f32.gmra.mrb[22].mxu0 %v243_v25 }
  0xba   : > { %409 = vmatprep.mubr.f32.mxu0 %v246_v26 }
  0xbd   : > { %410 = vmatmul.mubr.f32.gmra.mrb[24].mxu0 %v245_v27 }
  0xbe   : > { %414 = vmatprep.mubr.f32.mxu0 %v248_v28 }
  0xc1   : > { %415 = vmatmul.mubr.f32.gmra.mrb[26].mxu0 %v247_v29 }
  0xc2   : > { %419 = vmatprep.mubr.f32.mxu0 %v250_v30 }
  0xc5   : > { %420 = vmatmul.mubr.f32.gmra.mrb[28].mxu0 %v249_v31 }
  0xc6   : > { %424 = vmatprep.mubr.f32.mxu0 %v252_v32 }
  0xc9   : > { %425 = vmatmul.mubr.f32.gmra.mrb[30].mxu0 %v251_v33 }
 0x160   : > { %v783_v40 = vpop.f32.mrb[0].mxu0 }
 0x161   : > { %v784_v41 = vpop.f32.mrb[1].mxu0 }
 0x162   : > { %v785_v42 = vadd.f32 %v784_v41, %v783_v40 }
 0x164   : > { %v786_v43 = vpop.f32.mrb[2].mxu0  ;;  %895 = vmatprep.mubr.f32.mxu1 %v785_v42 }
 0x165   : > { %v787_v44 = vpop.f32.mrb[3].mxu0 }
 0x166   : > { %v788_v45 = vadd.f32 %v787_v44, %v786_v43 }
 0x168   : > { %v789_v46 = vpop.f32.mrb[4].mxu0  ;;  %896 = vmatmul.mubr.f32.vlgmr.msra.gmra.mrb[0].mxu1 %v788_v45 }
 0x169   : > { %v790_v47 = vpop.f32.mrb[5].mxu0 }
 0x16a   : > { %v791_v48 = vadd.f32 %v790_v47, %v789_v46 }
 0x16c   : > { %v792_v49 = vpop.f32.mrb[6].mxu0  ;;  %898 = vmatprep.mubr.f32.mxu1 %v791_v48 }
 0x16d   : > { %v793_v50 = vpop.f32.mrb[7].mxu0 }
 0x16e   : > { %v794_v51 = vadd.f32 %v793_v50, %v792_v49 }
 0x170   : > { %v795_v52 = vpop.f32.mrb[8].mxu0  ;;  %899 = vmatmul.mubr.f32.gmra.mrb[2].mxu1 %v794_v51 }
 0x171   : > { %v796_v53 = vpop.f32.mrb[9].mxu0 }
 0x172   : > { %v797_v54 = vadd.f32 %v796_v53, %v795_v52 }
 0x174   : > { %v798_v55 = vpop.f32.mrb[10].mxu0  ;;  %901 = vmatprep.mubr.f32.mxu1 %v797_v54 }
 0x175   : > { %v799_v56 = vpop.f32.mrb[11].mxu0 }
 0x176   : > { %v800_v57 = vadd.f32 %v799_v56, %v798_v55 }
 0x178   : > { %v801_v58 = vpop.f32.mrb[12].mxu0  ;;  %902 = vmatmul.mubr.f32.gmra.mrb[4].mxu1 %v800_v57 }
 0x179   : > { %v802_v59 = vpop.f32.mrb[13].mxu0 }
 0x17a   : > { %v803_v60 = vadd.f32 %v802_v59, %v801_v58 }
 0x17c   : > { %v804_v61 = vpop.f32.mrb[14].mxu0  ;;  %904 = vmatprep.mubr.f32.mxu1 %v803_v60 }
 0x17d   : > { %v805_v62 = vpop.f32.mrb[15].mxu0 }
 0x17e   : > { %v806_v63 = vadd.f32 %v805_v62, %v804_v61 }
 0x180   : > { %v807_v0 = vpop.f32.mrb[16].mxu0  ;;  %905 = vmatmul.mubr.f32.gmra.mrb[6].mxu1 %v806_v63 }
 0x181   : > { %v808_v1 = vpop.f32.mrb[17].mxu0 }
 0x182   : > { %v809_v2 = vadd.f32 %v808_v1, %v807_v0 }
 0x184   : > { %v810_v3 = vpop.f32.mrb[18].mxu0  ;;  %907 = vmatprep.mubr.f32.mxu1 %v809_v2 }
 0x185   : > { %v811_v4 = vpop.f32.mrb[19].mxu0 }
 0x186   : > { %v812_v5 = vadd.f32 %v811_v4, %v810_v3 }
 0x188   : > { %v813_v6 = vpop.f32.mrb[20].mxu0  ;;  %908 = vmatmul.mubr.f32.gmra.mrb[8].mxu1 %v812_v5 }
 0x189   : > { %v814_v7 = vpop.f32.mrb[21].mxu0 }
 0x18a   : > { %v815_v8 = vadd.f32 %v814_v7, %v813_v6 }
 0x18c   : > { %v816_v9 = vpop.f32.mrb[22].mxu0  ;;  %910 = vmatprep.mubr.f32.mxu1 %v815_v8 }
 0x18d   : > { %v817_v10 = vpop.f32.mrb[23].mxu0 }
 0x18e   : > { %v818_v11 = vadd.f32 %v817_v10, %v816_v9 }
 0x190   : > { %v819_v12 = vpop.f32.mrb[24].mxu0  ;;  %911 = vmatmul.mubr.f32.gmra.mrb[10].mxu1 %v818_v11 }
 0x191   : > { %v820_v13 = vpop.f32.mrb[25].mxu0 }
 0x192   : > { %v821_v14 = vadd.f32 %v820_v13, %v819_v12 }
 0x194   : > { %v822_v15 = vpop.f32.mrb[26].mxu0  ;;  %913 = vmatprep.mubr.f32.mxu1 %v821_v14 }
 0x195   : > { %v823_v16 = vpop.f32.mrb[27].mxu0 }
 0x196   : > { %v824_v17 = vadd.f32 %v823_v16, %v822_v15 }
 0x198   : > { %v825_v18 = vpop.f32.mrb[28].mxu0  ;;  %914 = vmatmul.mubr.f32.gmra.mrb[12].mxu1 %v824_v17 }
 0x199   : > { %v826_v19 = vpop.f32.mrb[29].mxu0 }
 0x19a   : > { %v827_v20 = vadd.f32 %v826_v19, %v825_v18 }
 0x19c   : > { %v828_v21 = vpop.f32.mrb[30].mxu0  ;;  %916 = vmatprep.mubr.f32.mxu1 %v827_v20 }
 0x19d   : > { %v829_v22 = vpop.f32.mrb[31].mxu0 }
 0x19e   : > { %v830_v23 = vadd.f32 %v829_v22, %v828_v21 }
 0x1a0   : > { %917 = vmatmul.mubr.f32.gmra.mrb[14].mxu1 %v830_v23 }
 0x23b   : > { %v897_v24 = vpop.f32.mrb[0].mxu1 }
 0x23c   : > { %1056 = vtanh.f32 %v897_v24  ;;  %v512_v25 = vpop.f32.mrb[1].mxu1 }
 0x23d   : > { %1058 = vtanh.f32 %v512_v25 }
 0x243   : > { %v900_v26 = vpop.f32.mrb[2].mxu1 }
 0x244   : > { %1060 = vtanh.f32 %v900_v26  ;;  %v522_v27 = vpop.f32.mrb[3].mxu1 }
 0x245   : > { %1062 = vtanh.f32 %v522_v27 }
 0x246   : > { %v1057_v28 = vpop.eup %1056 }
 0x247   : > { %v1059_v29 = vpop.eup %1058  ;;  %608 = vst [vmem:[%s1495_s20 + $0x8] sm:$0xff] %v1057_v28 }
 0x248   : > { %607 = vst [vmem:[%s1495_s20] sm:$0xff] %v1059_v29 }
 0x24b   : > { %v903_v30 = vpop.f32.mrb[4].mxu1 }
 0x24c   : > { %1064 = vtanh.f32 %v903_v30  ;;  %v532_v31 = vpop.f32.mrb[5].mxu1 }
 0x24d   : > { %1066 = vtanh.f32 %v532_v31 }
 0x24e   : > { %v1061_v32 = vpop.eup %1060 }
 0x24f   : > { %v1063_v33 = vpop.eup %1062  ;;  %610 = vst [vmem:[%s1495_s20 + $0x18] sm:$0xff] %v1061_v32 }
 0x250   : > { %609 = vst [vmem:[%s1495_s20 + $0x10] sm:$0xff] %v1063_v33 }
 0x253   : > { %v906_v34 = vpop.f32.mrb[6].mxu1 }
 0x254   : > { %1068 = vtanh.f32 %v906_v34  ;;  %v542_v35 = vpop.f32.mrb[7].mxu1 }
 0x255   : > { %1070 = vtanh.f32 %v542_v35 }
 0x256   : > { %v1065_v36 = vpop.eup %1064 }
 0x257   : > { %v1067_v37 = vpop.eup %1066  ;;  %612 = vst [vmem:[%s1495_s20 + $0x28] sm:$0xff] %v1065_v36 }
 0x258   : > { %611 = vst [vmem:[%s1495_s20 + $0x20] sm:$0xff] %v1067_v37 }
 0x25b   : > { %v909_v38 = vpop.f32.mrb[8].mxu1 }
 0x25c   : > { %1072 = vtanh.f32 %v909_v38  ;;  %v552_v39 = vpop.f32.mrb[9].mxu1 }
 0x25d   : > { %1074 = vtanh.f32 %v552_v39 }
 0x25e   : > { %v1069_v40 = vpop.eup %1068 }
 0x25f   : > { %v1071_v41 = vpop.eup %1070  ;;  %614 = vst [vmem:[%s1495_s20 + $0x38] sm:$0xff] %v1069_v40 }
 0x260   : > { %613 = vst [vmem:[%s1495_s20 + $0x30] sm:$0xff] %v1071_v41 }
 0x263   : > { %v912_v42 = vpop.f32.mrb[10].mxu1 }
 0x264   : > { %1076 = vtanh.f32 %v912_v42  ;;  %v562_v43 = vpop.f32.mrb[11].mxu1 }
 0x265   : > { %1078 = vtanh.f32 %v562_v43 }
 0x266   : > { %v1073_v44 = vpop.eup %1072 }
 0x267   : > { %v1075_v45 = vpop.eup %1074  ;;  %616 = vst [vmem:[%s1495_s20 + $0x48] sm:$0xff] %v1073_v44 }
 0x268   : > { %615 = vst [vmem:[%s1495_s20 + $0x40] sm:$0xff] %v1075_v45 }
 0x26b   : > { %v915_v46 = vpop.f32.mrb[12].mxu1 }
 0x26c   : > { %1080 = vtanh.f32 %v915_v46  ;;  %v572_v47 = vpop.f32.mrb[13].mxu1 }
 0x26d   : > { %1082 = vtanh.f32 %v572_v47 }
 0x26e   : > { %v1077_v48 = vpop.eup %1076 }
 0x26f   : > { %v1079_v49 = vpop.eup %1078  ;;  %618 = vst [vmem:[%s1495_s20 + $0x58] sm:$0xff] %v1077_v48 }
 0x270   : > { %617 = vst [vmem:[%s1495_s20 + $0x50] sm:$0xff] %v1079_v49 }
 0x273   : > { %v918_v50 = vpop.f32.mrb[14].mxu1 }
 0x274   : > { %1084 = vtanh.f32 %v918_v50  ;;  %v582_v51 = vpop.f32.mrb[15].mxu1 }
 0x275   : > { %1086 = vtanh.f32 %v582_v51 }
 0x276   : > { %v1081_v52 = vpop.eup %1080 }
 0x277   : > { %v1083_v53 = vpop.eup %1082  ;;  %620 = vst [vmem:[%s1495_s20 + $0x68] sm:$0xff] %v1081_v52 }
 0x278   : > { %619 = vst [vmem:[%s1495_s20 + $0x60] sm:$0xff] %v1083_v53 }
 0x27e   : > { %v1085_v54 = vpop.eup %1084 }
 0x27f   : > { %v1087_v55 = vpop.eup %1086  ;;  %622 = vst [vmem:[%s1495_s20 + $0x78] sm:$0xff] %v1085_v54 }
 0x280   : > { %621 = vst [vmem:[%s1495_s20 + $0x70] sm:$0xff] %v1087_v55 }
 0x281   : > { %1187 = shalt.err (!%p1184_p2)
}
 0x282   : > { %s1188_s7 = scalar_lea.hbm %s1516_s23, 2048  ;;  %s1192_s22 = scalar_lea.hbm %s1567_s3, 4096 }
 0x283   : > { %p1189_p13 = scmp.ne.s32.totalorder %s1516_s23, %s1188_s7  ;;  %p1193_p4 = scmp.lt.u32.totalorder %s1516_s23, %s1567_s3 }
 0x284   : > { %p1194_p5 = scmp.lt.u32.totalorder %s1192_s22, %s1188_s7  ;;  %p1196_p11 = scmp.lt.u32.totalorder %s1188_s7, %s1516_s23 }
 0x285   : > { %p1190_p6 = pnand %p1189_p13, %p1581_p0 }
 0x286   : > { %p1195_p8 = por %p1194_p5, %p1193_p4 }
 0x287   : > { %p1191_p10 = pneg %p1190_p6 }
 0x288   : > { %p1197_p1 = por %p1196_p11, %p1195_p8 }
 0x28a   : > { %p1198_p3 = pnand %p1197_p1, %p1191_p10 }
 0x28c   : > { %1201 = shalt.err (!%p1198_p3)
}
 0x28d   : > { %s1254_s18 = smov 128   ;;  %s1255_s20 = smov 8  }
 0x28e   : > { %993 = dma.vmem_to_hbm [thread:$0]  (%p1581_p0), %s1518_s24, 2048, %s1516_s23, %s624_s5, %s1254_s18, %s1254_s18, %s1255_s20  }
 0x28f PF: > { %s652_s17 = sand.u32 1, %s1232_s12   ;;  %p1582_p7 = scmp.ne.s32.totalorder %s1572_s19, 0 }
 0x290   : > { %p1583_p9 = scmp.ge.s32.totalorder %s1244_s15, 2  ;;  %s653_s26 = scalar_lea.sflag [#allocation4], %s652_s17 }
 0x292   : > { %p1007_p12 = pnand %p1583_p9, %p1582_p7 }
 0x294   : > { %1227 = dma.done.wait (!%p1007_p12), %s653_s26, 2048  }
 0x295   : > { %1229 = vsyncadd (!%p1007_p12), %s653_s26, 4294965248  ;;  %p17_p2 = scmp.ge.s32.totalorder %s1386_s4, 4   ;;  %s1584_s12 = smov %s1236_s13 }
 0x296   : > { %s1585_s13 = smov %s1240_s14  ;;  %s1586_s14 = smov %s1402_s9 }
 0x297   : > { %s1587_s15 = smov %s1386_s4  ;;  %19 = sbr.rel (!%p17_p2) target bundleno = 6 (0x6), region = 85 }
 0x29e   :  { %658 = vsyncpa [#allocation3], 1 }
 0x29f   :  { %660 = vsyncpa [#allocation3 + $0x1], 1 }
 0x2a0   :  { %661 = vsyncpa [#allocation6], 1 }
 0x2a1   :  { %662 = vsyncpa [#allocation4], 1 }
 0x2a2   :  { %664 = vsyncpa [#allocation4 + $0x1], 1 }

// kernel: tpu_custom_call.1
= control target key start
LH: loop header
LB: loop body
LE: loop exit
PB: predicated region body
PF: predicated region fallthrough
CT: control target
= control target key end

     0   :  { %8 = vsyncpa [#allocation3], 0  ;;  %s1564_s0 = inlined_call_operand.hbm [shape: f32[256,256], index: 0, kind: input, shape index: {}]   ;;  %s1565_s1 = inlined_call_operand.hbm [shape: f32[256,128], index: 1, kind: input, shape index: {}]   ;;  %s1566_s2 = inlined_call_operand.hbm [shape: f32[128,128], index: 2, kind: input, shape index: {}]   ;;  %s1567_s3 = inlined_call_operand.hbm [shape: f32[256,128], index: 3, kind: output, shape index: {}]  }
   0x1   :  { %10 = vsyncpa [#allocation3 + $0x1], 0 }
   0x2   :  { %11 = vsyncpa [#allocation6], 0 }
   0x3   :  { %12 = vsyncpa [#allocation4], 0 }
   0x4   :  { %14 = vsyncpa [#allocation4 + $0x1], 0  ;;  %s1276_s12 = smov 0   ;;  %s1278_s13 = smov 0  }
   0x5   :  { %s1280_s14 = smov 0   ;;  %s1282_s15 = smov 0  }
   0x6 LB: > { %s1297_s16 = sadd.s32 4294967295, %s1244_s15   ;;  %s729_s17 = sadd.s32 4294967294, %s1244_s15   ;;  %s1244_s15 = sphi %s1282_s15, %s1587_s15   ;;  %s1240_s14 = sphi %s1280_s14, %s1586_s14   ;;  %s1236_s13 = sphi %s1278_s13, %s1585_s13   ;;  %s1232_s12 = sphi %s1276_s12, %s1584_s12  }
   0x7   : > { %p40_p0 = scmp.ne.s32.totalorder %s1236_s13, %s1232_s12  ;;  %p1568_p1 = scmp.eq.s32.totalorder %s1297_s16, 0 }
   0x8   : > { %p112_p3 = scmp.eq.s32.totalorder %s729_s17, 1  ;;  %p730_p5 = scmp.ge.s32.totalorder %s1244_s15, 1 }
   0x9   : > { %p1306_p4 = por %p1568_p1, %p40_p0  ;;  %p119_p7 = scmp.lt.s32.totalorder %s1244_s15, 3 }
   0xa   : > { %p1311_p6 = por %p112_p3, %p40_p0  ;;  %s1246_s21 = smov [#allocation5]  }
   0xb   : > { %s1571_s18 = scalar_select %p1306_p4, 1, 0 }
   0xc   : > { %s1572_s19 = scalar_select %p1311_p6, 1, 0 }
   0xd   : > { %p1316_p8 = pnand %p730_p5, %p119_p7  ;;  %s131_s22 = sshll.u32 %s1246_s21, 4  ;;  %s1320_s22 = int_to_ptr.vmem [resolvable:$true] %s131_s22 }
   0xe   : > { %s1247_s24 = smov [#allocation7]   ;;  %s1088_s28 = scalar_lea.hbm %s1565_s1, 4096 }
   0xf   : > { %p995_p9 = pneg %p1316_p8  ;;  %s144_s25 = sshll.u32 %s1247_s24, 4  ;;  %s1331_s25 = int_to_ptr.vmem [resolvable:$true] %s144_s25 }
  0x10   : > { %p1089_p12 = scmp.ne.s32.totalorder %s1565_s1, %s1088_s28  ;;  %p1095_p5 = scmp.lt.u32.totalorder %s1088_s28, %s1565_s1 }
  0x11   : > { %p1327_p11 = pnand %p995_p9, %p1568_p1 }
  0x13   : > { %p1090_p13 = pneg %p1327_p11 }
  0x15   : > { %p1091_p0 = pnand %p1090_p13, %p1089_p12 }
  0x17   : > { %p1092_p3 = pneg %p1091_p0 }
  0x19   : > { %p1097_p7 = pnand %p1095_p5, %p1092_p3 }
  0x1b   : > { %1100 = shalt.err (!%p1097_p7)
}
  0x1c   : > { %s1101_s6 = scalar_lea.vmem %s1320_s22, 4096  ;;  %p1109_p2 = scmp.lt.s32.totalorder %s1320_s22, %s1320_s22 }
  0x1d   : > { %p1102_p9 = scmp.ne.s32.totalorder %s1320_s22, %s1101_s6  ;;  %p1110_p12 = scmp.lt.s32.totalorder %s1101_s6, %s1101_s6 }
  0x1f   : > { %p1104_p10 = pnand %p1102_p9, %p1090_p13  ;;  %p1111_p0 = por %p1110_p12, %p1109_p2 }
  0x21   : > { %p1105_p1 = pneg %p1104_p10 }
  0x23   : > { %p1112_p6 = pnand %p1111_p0, %p1105_p1 }
  0x25   : > { %1115 = shalt.err (!%p1112_p6)
}
  0x26   : > { %s1248_s7 = smov 128   ;;  %s1249_s8 = smov 8  }
  0x27   : > { %998 = dma.hbm_to_vmem [thread:$0]  (!%p1327_p11), %s1565_s1, 4096, %s1320_s22, [#allocation6], %s1248_s7, %s1248_s7, %s1249_s8  }
  0x28   : > { %s1116_s21 = scalar_lea.hbm %s1566_s2, 2048 }
  0x29   : > { %p1117_p2 = scmp.ne.s32.totalorder %s1566_s2, %s1116_s21  ;;  %p1123_p10 = scmp.lt.u32.totalorder %s1116_s21, %s1566_s2 }
  0x2b   : > { %p1119_p1 = pnand %p1117_p2, %p1090_p13 }
  0x2d   : > { %p1120_p6 = pneg %p1119_p1 }
  0x2f   : > { %p1125_p3 = pnand %p1123_p10, %p1120_p6 }
  0x31   : > { %1128 = shalt.err (!%p1125_p3)
}
  0x32   : > { %s1129_s22 = scalar_lea.vmem %s1331_s25, 2048  ;;  %p1137_p12 = scmp.lt.s32.totalorder %s1331_s25, %s1331_s25 }
  0x33   : > { %p1130_p5 = scmp.ne.s32.totalorder %s1331_s25, %s1129_s22  ;;  %p1138_p0 = scmp.lt.s32.totalorder %s1129_s22, %s1129_s22 }
  0x35   : > { %p1132_p7 = pnand %p1130_p5, %p1090_p13  ;;  %p1139_p2 = por %p1138_p0, %p1137_p12 }
  0x37   : > { %p1133_p9 = pneg %p1132_p7 }
  0x39   : > { %p1140_p1 = pnand %p1139_p2, %p1133_p9 }
  0x3b   : > { %1143 = shalt.err (!%p1140_p1)
}
  0x3c   : > { %1001 = dma.hbm_to_vmem [thread:$0]  (!%p1327_p11), %s1566_s2, 2048, %s1331_s25, [#allocation6], %s1248_s7, %s1248_s7, %s1249_s8  }
  0x3d   : > { %s1386_s4 = sadd.s32 1, %s1244_s15   ;;  %s27_s23 = sadd.s32 1, %s1240_s14 }
  0x3e   : > { %s24_s5 = ssub.s32 %s1244_s15, %s1386_s4  ;;  %p34_p13 = scmp.ne.s32.totalorder %s1240_s14, %s1236_s13 }
  0x3f   : > { %p25_p6 = scmp.eq.s32.totalorder %s24_s5, 0  ;;  %p35_p10 = scmp.eq.s32.totalorder %s1244_s15, 0 }
  0x40   : > { %p1575_p3 = scmp.eq.s32.totalorder %s1297_s16, 1  ;;  %p1012_p7 = scmp.lt.s32.totalorder %s1244_s15, 2 }
  0x41   : > { %s1402_s9 = scalar_select %p25_p6, %s1240_s14, %s27_s23  }
  0x42   : > { %p1396_p5 = por %p1575_p3, %p34_p13  ;;  %p36_p9 = por %p35_p10, %p34_p13 }
  0x43   : > { %s158_s10 = sand.u32 1, %s1240_s14   ;;  %s749_s25 = sshll.u32 %s1244_s15, 12 }
  0x44   : > { %s1576_s6 = scalar_select %p1396_p5, 1, 0 }
  0x45   : > { %s734_s11 = sshll.u32 %s158_s10, 8  ;;  %s1409_s17 = scalar_lea.hbm %s1564_s0, %s749_s25 }
  0x46   : > { %s162_s21 = scalar_lea.vmem [#allocation2], %s734_s11  ;;  %p1413_p11 = pnand %p1012_p7, %p36_p9 }
  0x47   : > { %s170_s24 = sshll.u32 %s162_s21, 4  ;;  %s1417_s27 = scalar_lea.sflag [#allocation3], %s158_s10  ;;  %s1411_s24 = int_to_ptr.vmem [resolvable:$true] %s170_s24 }
  0x48   : > { %s1144_s28 = scalar_lea.hbm %s1409_s17, 4096  ;;  %p1146_p0 = pneg %p1413_p11 }
  0x49   : > { %p1145_p12 = scmp.ne.s32.totalorder %s1409_s17, %s1144_s28  ;;  %s1149_s30 = scalar_lea.hbm %s1564_s0, 8192 }
  0x4a   : > { %p1150_p13 = scmp.lt.u32.totalorder %s1409_s17, %s1564_s0  ;;  %p1151_p6 = scmp.lt.u32.totalorder %s1149_s30, %s1144_s28 }
  0x4b   : > { %p1147_p2 = pnand %p1146_p0, %p1145_p12  ;;  %p1153_p3 = scmp.lt.u32.totalorder %s1144_s28, %s1409_s17 }
  0x4c   : > { %p1152_p10 = por %p1151_p6, %p1150_p13 }
  0x4d   : > { %p1148_p1 = pneg %p1147_p2 }
  0x4e   : > { %p1154_p7 = por %p1153_p3, %p1152_p10 }
  0x50   : > { %p1155_p9 = pnand %p1154_p7, %p1148_p1 }
  0x52   : > { %1158 = shalt.err (!%p1155_p9)
}
  0x53   : > { %s1159_s10 = scalar_lea.vmem %s1411_s24, 4096  ;;  %s1250_s11 = smov [#allocation2]  }
  0x54   : > { %p1160_p12 = scmp.ne.s32.totalorder %s1411_s24, %s1159_s10  ;;  %s1164_s25 = sshll.u32 %s1250_s11, 4  ;;  %s1165_s25 = int_to_ptr.vmem [resolvable:$false] %s1164_s25 }
  0x55   : > { %s1166_s7 = scalar_lea.vmem %s1165_s25, 8192  ;;  %p1167_p4 = scmp.lt.s32.totalorder %s1411_s24, %s1165_s25 }
  0x56   : > { %p1162_p2 = pnand %p1160_p12, %p1146_p0  ;;  %p1168_p13 = scmp.lt.s32.totalorder %s1166_s7, %s1159_s10 }
  0x58   : > { %p1163_p5 = pneg %p1162_p2  ;;  %p1169_p6 = por %p1168_p13, %p1167_p4 }
  0x5a   : > { %p1170_p10 = pnand %p1169_p6, %p1163_p5 }
  0x5c   : > { %1173 = shalt.err (!%p1170_p10)
}
  0x5d   : > { %s1251_s8 = smov 256   ;;  %s1252_s21 = smov 16  }
  0x5e   : > { %1005 = dma.hbm_to_vmem [thread:$0]  (!%p1413_p11), %s1409_s17, 4096, %s1411_s24, %s1417_s27, %s1251_s8, %s1251_s8, %s1252_s21  }
  0x5f   : > { %182 = sbr.rel (%p1316_p8) target bundleno = 655 (0x28f), region = 32  ;;  %s1448_s28 = sand.u32 (!%p1316_p8), 1, %s1236_s13  }
  0x60   : > { %s739_s22 = sshll.u32 (!%p1316_p8), %s1448_s28, 8  ;;  %s185_s29 = scalar_lea.sflag (!%p1316_p8), [#allocation3], %s1448_s28 }
  0x61   : > { %s1452_s30 = scalar_lea.vmem (!%p1316_p8), [#allocation2], %s739_s22  ;;  %p1578_p4 = scmp.ne.s32.totalorder (!%p1316_p8), %s1571_s18, 0 }
  0x66   : > { %1219 = dma.done.wait (%p1578_p4), %s185_s29, 4096  }
  0x67   : > { %1221 = vsyncadd (%p1578_p4), %s185_s29, 4294963200  ;;  %p1579_p5 = scmp.eq.s32.totalorder %s1297_s16, 0 }
  0x69   : > { %1223 = dma.done.wait (%p1579_p5), [#allocation6], 6144   ;;  %p1580_p8 = pmov %p1579_p5 }
  0x6a   : > { %v269_v0 = vld [vmem:[#allocation5 + $0x80] sm:$0xff]  ;;  %v270_v1 = vld [vmem:[#allocation5 + $0x88] sm:$0xff]  ;;  %v271_v5 = vld [vmem:[#allocation5 + $0x90] sm:$0xff]  ;;  %s742_s18 = sshll.u32 %s1448_s28, 7  ;;  %s750_s17 = sshll.u32 %s1297_s16, 11 }
  0x6b   : > { %1225 = vsyncadd (%p1580_p8), [#allocation6], 4294961152  ;;  %v253_v2 = vld [vmem:[#allocation5] sm:$0xff]  ;;  %v919_v3 = vpack.c.bf16 %v270_v1, %v269_v0  ;;  %v254_v4 = vld [vmem:[#allocation5 + $0x8] sm:$0xff]  ;;  %s1495_s20 = scalar_lea.vmem [#allocation8], %s742_s18  ;;  %s1516_s23 = scalar_lea.hbm %s1567_s3, %s750_s17 }
  0x6c   : > { %v272_v6 = vld [vmem:[#allocation5 + $0x98] sm:$0xff]  ;;  %v921_v7 = vpack.c.bf16 %v254_v4, %v253_v2  ;;  %v255_v9 = vld [vmem:[#allocation5 + $0x10] sm:$0xff]  ;;  %v273_v11 = vld [vmem:[#allocation5 + $0xa0] sm:$0xff]  ;;  %s637_s24 = sshll.u32 %s1495_s20, 4  ;;  %s624_s5 = scalar_lea.sflag [#allocation4], %s1448_s28  ;;  %s1518_s24 = int_to_ptr.vmem [resolvable:$true] %s637_s24 }
  0x6d   : > { %v923_v8 = vpack.c.bf16 %v272_v6, %v271_v5  ;;  %v256_v10 = vld [vmem:[#allocation5 + $0x18] sm:$0xff]  ;;  %920 = vmatprep.subr.bf16.mxu0 %v919_v3  ;;  %v274_v12 = vld [vmem:[#allocation5 + $0xa8] sm:$0xff]  ;;  %v257_v15 = vld [vmem:[#allocation5 + $0x20] sm:$0xff]  ;;  %s1174_s10 = scalar_lea.vmem %s1518_s24, 2048  ;;  %p1581_p0 = scmp.ne.s32.totalorder %s1576_s6, 0 }
  0x6e   : > { %922 = vmatpush3.bf16.msra.mxu0 %v921_v7  ;;  %v925_v13 = vpack.c.bf16 %v256_v10, %v255_v9  ;;  %v927_v14 = vpack.c.bf16 %v274_v12, %v273_v11  ;;  %v258_v16 = vld [vmem:[#allocation5 + $0x28] sm:$0xff]  ;;  %v275_v17 = vld [vmem:[#allocation5 + $0xb0] sm:$0xff]  ;;  %v276_v18 = vld [vmem:[#allocation5 + $0xb8] sm:$0xff]  ;;  %p1175_p11 = scmp.ne.s32.totalorder %s1518_s24, %s1174_s10  ;;  %s1253_s16 = smov [#allocation8]  }
  0x6f   : > { %924 = vmatprep.subr.bf16.mxu0 %v923_v8  ;;  %v929_v19 = vpack.c.bf16 %v258_v16, %v257_v15  ;;  %v931_v20 = vpack.c.bf16 %v276_v18, %v275_v17  ;;  %v259_v21 = vld [vmem:[#allocation5 + $0x30] sm:$0xff]  ;;  %v260_v22 = vld [vmem:[#allocation5 + $0x38] sm:$0xff]  ;;  %v277_v23 = vld [vmem:[#allocation5 + $0xc0] sm:$0xff]  ;;  %s1178_s11 = sshll.u32 %s1253_s16, 4  ;;  %s1179_s11 = int_to_ptr.vmem [resolvable:$false] %s1178_s11 }
  0x70   : > { %v278_v24 = vld [vmem:[#allocation5 + $0xc8] sm:$0xff]  ;;  %v933_v26 = vpack.c.bf16 %v260_v22, %v259_v21  ;;  %v261_v28 = vld [vmem:[#allocation5 + $0x40] sm:$0xff]  ;;  %v279_v30 = vld [vmem:[#allocation5 + $0xd0] sm:$0xff]  ;;  %p1176_p1 = pnand %p1175_p11, %p1581_p0  ;;  %s1180_s25 = scalar_lea.vmem %s1179_s11, 4096 }
  0x71   : > { %v222_v25 = vld [vmem:[%s1452_s30 + $0x8] sm:$0xff]  ;;  %v935_v27 = vpack.c.bf16 %v278_v24, %v277_v23  ;;  %v280_v31 = vld [vmem:[#allocation5 + $0xd8] sm:$0xff]  ;;  %v263_v34 = vld [vmem:[#allocation5 + $0x50] sm:$0xff]  ;;  %p1181_p7 = scmp.lt.s32.totalorder %s1518_s24, %s1179_s11  ;;  %p1182_p9 = scmp.lt.s32.totalorder %s1180_s25, %s1174_s10 }
  0x72   : > { %926 = vmatpush3.bf16.msra.mxu0 %v925_v13  ;;  %349 = vmatprep.mubr.f32.mxu0 %v222_v25  ;;  %v262_v29 = vld [vmem:[#allocation5 + $0x48] sm:$0xff]  ;;  %v939_v33 = vpack.c.bf16 %v280_v31, %v279_v30  ;;  %v264_v35 = vld [vmem:[#allocation5 + $0x58] sm:$0xff]  ;;  %v281_v36 = vld [vmem:[#allocation5 + $0xe0] sm:$0xff]  ;;  %p1177_p3 = pneg %p1176_p1 }
  0x73   : > { %928 = vmatprep.subr.bf16.mxu0 %v927_v14  ;;  %v937_v32 = vpack.c.bf16 %v262_v29, %v261_v28  ;;  %v282_v37 = vld [vmem:[#allocation5 + $0xe8] sm:$0xff]  ;;  %v941_v38 = vpack.c.bf16 %v264_v35, %v263_v34  ;;  %v265_v39 = vld [vmem:[#allocation5 + $0x60] sm:$0xff]  ;;  %v283_v42 = vld [vmem:[#allocation5 + $0xf0] sm:$0xff]  ;;  %p1183_p12 = por %p1182_p9, %p1181_p7 }
  0x74   : > { %v266_v40 = vld [vmem:[#allocation5 + $0x68] sm:$0xff]  ;;  %v943_v41 = vpack.c.bf16 %v282_v37, %v281_v36  ;;  %v430_v43 = vld [vmem:[#allocation7] sm:$0xff]  ;;  %v284_v45 = vld [vmem:[#allocation5 + $0xf8] sm:$0xff] }
  0x75   : > { %v431_v44 = vld [vmem:[#allocation7 + $0x8] sm:$0xff]  ;;  %v432_v47 = vld [vmem:[#allocation7 + $0x10] sm:$0xff]  ;;  %v433_v48 = vld [vmem:[#allocation7 + $0x18] sm:$0xff]  ;;  %v945_v52 = vpack.c.bf16 %v266_v40, %v265_v39  ;;  %v947_v53 = vpack.c.bf16 %v284_v45, %v283_v42  ;;  %p1184_p2 = pnand %p1183_p12, %p1177_p3 }
  0x76   : > { %930 = vmatpush3.bf16.msra.mxu0 %v929_v19  ;;  %v951_v46 = vpack.c.bf16 %v431_v44, %v430_v43  ;;  %v955_v49 = vpack.c.bf16 %v433_v48, %v432_v47  ;;  %v434_v50 = vld [vmem:[#allocation7 + $0x20] sm:$0xff]  ;;  %v435_v51 = vld [vmem:[#allocation7 + $0x28] sm:$0xff]  ;;  %v267_v54 = vld [vmem:[#allocation5 + $0x70] sm:$0xff] }
  0x77   : > { %932 = vmatprep.subr.bf16.mxu0 %v931_v20  ;;  %v268_v55 = vld [vmem:[#allocation5 + $0x78] sm:$0xff]  ;;  %v959_v56 = vpack.c.bf16 %v435_v51, %v434_v50  ;;  %v436_v57 = vld [vmem:[#allocation7 + $0x30] sm:$0xff]  ;;  %v438_v61 = vld [vmem:[#allocation7 + $0x40] sm:$0xff] }
  0x78   : > { %952 = vmatprep.subr.bf16.mxu1 %v951_v46  ;;  %v437_v58 = vld [vmem:[#allocation7 + $0x38] sm:$0xff]  ;;  %v949_v59 = vpack.c.bf16 %v268_v55, %v267_v54  ;;  %v439_v62 = vld [vmem:[#allocation7 + $0x48] sm:$0xff]  ;;  %v221_v63 = vld [vmem:[%s1452_s30] sm:$0xff] }
  0x79   : > { %954 = vmatpush3.bf16.msra.mxu1 %v951_v46  ;;  %v963_v60 = vpack.c.bf16 %v437_v58, %v436_v57  ;;  %v224_v0 = vld [vmem:[%s1452_s30 + $0x18] sm:$0xff]  ;;  %v967_v1 = vpack.c.bf16 %v439_v62, %v438_v61  ;;  %v440_v2 = vld [vmem:[#allocation7 + $0x50] sm:$0xff]  ;;  %v226_v5 = vld [vmem:[%s1452_s30 + $0x28] sm:$0xff] }
  0x7a   : > { %934 = vmatpush3.bf16.msra.mxu0 %v933_v26  ;;  %956 = vmatprep.subr.bf16.mxu1 %v955_v49  ;;  %v441_v3 = vld [vmem:[#allocation7 + $0x58] sm:$0xff]  ;;  %v223_v4 = vld [vmem:[%s1452_s30 + $0x10] sm:$0xff]  ;;  %v225_v7 = vld [vmem:[%s1452_s30 + $0x20] sm:$0xff] }
  0x7b   : > { %936 = vmatprep.subr.bf16.mxu0 %v935_v27  ;;  %v971_v6 = vpack.c.bf16 %v441_v3, %v440_v2  ;;  %v228_v8 = vld [vmem:[%s1452_s30 + $0x38] sm:$0xff]  ;;  %v227_v9 = vld [vmem:[%s1452_s30 + $0x30] sm:$0xff]  ;;  %v230_v10 = vld [vmem:[%s1452_s30 + $0x48] sm:$0xff] }
  0x7c   : > { %v229_v11 = vld [vmem:[%s1452_s30 + $0x40] sm:$0xff]  ;;  %v232_v12 = vld [vmem:[%s1452_s30 + $0x58] sm:$0xff]  ;;  %v231_v13 = vld [vmem:[%s1452_s30 + $0x50] sm:$0xff] }
  0x7d   : > { %958 = vmatpush3.bf16.msra.mxu1 %v955_v49  ;;  %v234_v14 = vld [vmem:[%s1452_s30 + $0x68] sm:$0xff]  ;;  %v233_v15 = vld [vmem:[%s1452_s30 + $0x60] sm:$0xff]  ;;  %v236_v16 = vld [vmem:[%s1452_s30 + $0x78] sm:$0xff] }
  0x7e   : > { %938 = vmatpush3.bf16.msra.mxu0 %v937_v32  ;;  %960 = vmatprep.subr.bf16.mxu1 %v959_v56  ;;  %v235_v17 = vld [vmem:[%s1452_s30 + $0x70] sm:$0xff]  ;;  %v238_v18 = vld [vmem:[%s1452_s30 + $0x88] sm:$0xff]  ;;  %v237_v19 = vld [vmem:[%s1452_s30 + $0x80] sm:$0xff] }
  0x7f   : > { %940 = vmatprep.subr.bf16.mxu0 %v939_v33  ;;  %v240_v20 = vld [vmem:[%s1452_s30 + $0x98] sm:$0xff]  ;;  %v239_v21 = vld [vmem:[%s1452_s30 + $0x90] sm:$0xff]  ;;  %v242_v22 = vld [vmem:[%s1452_s30 + $0xa8] sm:$0xff] }
  0x80   : > { %v241_v23 = vld [vmem:[%s1452_s30 + $0xa0] sm:$0xff]  ;;  %v244_v24 = vld [vmem:[%s1452_s30 + $0xb8] sm:$0xff]  ;;  %v243_v25 = vld [vmem:[%s1452_s30 + $0xb0] sm:$0xff] }
  0x81   : > { %962 = vmatpush3.bf16.msra.mxu1 %v959_v56  ;;  %v246_v26 = vld [vmem:[%s1452_s30 + $0xc8] sm:$0xff]  ;;  %v245_v27 = vld [vmem:[%s1452_s30 + $0xc0] sm:$0xff]  ;;  %v248_v28 = vld [vmem:[%s1452_s30 + $0xd8] sm:$0xff] }
  0x82   : > { %942 = vmatpush3.bf16.msra.mxu0 %v941_v38  ;;  %964 = vmatprep.subr.bf16.mxu1 %v963_v60  ;;  %v247_v29 = vld [vmem:[%s1452_s30 + $0xd0] sm:$0xff]  ;;  %v250_v30 = vld [vmem:[%s1452_s30 + $0xe8] sm:$0xff]  ;;  %v249_v31 = vld [vmem:[%s1452_s30 + $0xe0] sm:$0xff] }
  0x83   : > { %944 = vmatprep.subr.bf16.mxu0 %v943_v41  ;;  %v252_v32 = vld [vmem:[%s1452_s30 + $0xf8] sm:$0xff]  ;;  %v251_v33 = vld [vmem:[%s1452_s30 + $0xf0] sm:$0xff]  ;;  %v442_v34 = vld [vmem:[#allocation7 + $0x60] sm:$0xff] }
  0x84   : > { %v443_v35 = vld [vmem:[#allocation7 + $0x68] sm:$0xff]  ;;  %v444_v37 = vld [vmem:[#allocation7 + $0x70] sm:$0xff]  ;;  %v445_v38 = vld [vmem:[#allocation7 + $0x78] sm:$0xff] }
  0x85   : > { %966 = vmatpush3.bf16.msra.mxu1 %v963_v60  ;;  %v975_v36 = vpack.c.bf16 %v443_v35, %v442_v34  ;;  %v979_v39 = vpack.c.bf16 %v445_v38, %v444_v37 }
  0x86   : > { %946 = vmatpush3.bf16.msra.mxu0 %v945_v52  ;;  %968 = vmatprep.subr.bf16.mxu1 %v967_v1 }
  0x87   : > { %948 = vmatprep.subr.bf16.mxu0 %v947_v53 }
  0x89   : > { %970 = vmatpush3.bf16.msra.mxu1 %v967_v1 }
  0x8a   : > { %950 = vmatpush3.bf16.msra.mxu0 %v949_v59  ;;  %972 = vmatprep.subr.bf16.mxu1 %v971_v6 }
  0x8d   : > { %350 = vmatmul.mubr.f32.vlgmr.msra.gmra.mrb[0].mxu0 %v221_v63  ;;  %974 = vmatpush3.bf16.msra.mxu1 %v971_v6 }
  0x8e   : > { %354 = vmatprep.mubr.f32.mxu0 %v224_v0  ;;  %976 = vmatprep.subr.bf16.mxu1 %v975_v36 }
  0x91   : > { %355 = vmatmul.mubr.f32.gmra.mrb[2].mxu0 %v223_v4  ;;  %978 = vmatpush3.bf16.msra.mxu1 %v975_v36 }
  0x92   : > { %359 = vmatprep.mubr.f32.mxu0 %v226_v5  ;;  %980 = vmatprep.subr.bf16.mxu1 %v979_v39 }
  0x95   : > { %360 = vmatmul.mubr.f32.gmra.mrb[4].mxu0 %v225_v7  ;;  %982 = vmatpush3.bf16.msra.mxu1 %v979_v39 }
  0x96   : > { %364 = vmatprep.mubr.f32.mxu0 %v228_v8 }
  0x99   : > { %365 = vmatmul.mubr.f32.gmra.mrb[6].mxu0 %v227_v9 }
  0x9a   : > { %369 = vmatprep.mubr.f32.mxu0 %v230_v10 }
  0x9d   : > { %370 = vmatmul.mubr.f32.gmra.mrb[8].mxu0 %v229_v11 }
  0x9e   : > { %374 = vmatprep.mubr.f32.mxu0 %v232_v12 }
  0xa1   : > { %375 = vmatmul.mubr.f32.gmra.mrb[10].mxu0 %v231_v13 }
  0xa2   : > { %379 = vmatprep.mubr.f32.mxu0 %v234_v14 }
  0xa5   : > { %380 = vmatmul.mubr.f32.gmra.mrb[12].mxu0 %v233_v15 }
  0xa6   : > { %384 = vmatprep.mubr.f32.mxu0 %v236_v16 }
  0xa9   : > { %385 = vmatmul.mubr.f32.gmra.mrb[14].mxu0 %v235_v17 }
  0xaa   : > { %389 = vmatprep.mubr.f32.mxu0 %v238_v18 }
  0xad   : > { %390 = vmatmul.mubr.f32.gmra.mrb[16].mxu0 %v237_v19 }
  0xae   : > { %394 = vmatprep.mubr.f32.mxu0 %v240_v20 }
  0xb1   : > { %395 = vmatmul.mubr.f32.gmra.mrb[18].mxu0 %v239_v21 }
  0xb2   : > { %399 = vmatprep.mubr.f32.mxu0 %v242_v22 }
  0xb5   : > { %400 = vmatmul.mubr.f32.gmra.mrb[20].mxu0 %v241_v23 }
  0xb6   : > { %404 = vmatprep.mubr.f32.mxu0 %v244_v24 }
  0xb9   : > { %405 = vmatmul.mubr.f32.gmra.mrb[22].mxu0 %v243_v25 }
  0xba   : > { %409 = vmatprep.mubr.f32.mxu0 %v246_v26 }
  0xbd   : > { %410 = vmatmul.mubr.f32.gmra.mrb[24].mxu0 %v245_v27 }
  0xbe   : > { %414 = vmatprep.mubr.f32.mxu0 %v248_v28 }
  0xc1   : > { %415 = vmatmul.mubr.f32.gmra.mrb[26].mxu0 %v247_v29 }
  0xc2   : > { %419 = vmatprep.mubr.f32.mxu0 %v250_v30 }
  0xc5   : > { %420 = vmatmul.mubr.f32.gmra.mrb[28].mxu0 %v249_v31 }
  0xc6   : > { %424 = vmatprep.mubr.f32.mxu0 %v252_v32 }
  0xc9   : > { %425 = vmatmul.mubr.f32.gmra.mrb[30].mxu0 %v251_v33 }
 0x160   : > { %v783_v40 = vpop.f32.mrb[0].mxu0 }
 0x161   : > { %v784_v41 = vpop.f32.mrb[1].mxu0 }
 0x162   : > { %v785_v42 = vadd.f32 %v784_v41, %v783_v40 }
 0x164   : > { %v786_v43 = vpop.f32.mrb[2].mxu0  ;;  %895 = vmatprep.mubr.f32.mxu1 %v785_v42 }
 0x165   : > { %v787_v44 = vpop.f32.mrb[3].mxu0 }
 0x166   : > { %v788_v45 = vadd.f32 %v787_v44, %v786_v43 }
 0x168   : > { %v789_v46 = vpop.f32.mrb[4].mxu0  ;;  %896 = vmatmul.mubr.f32.vlgmr.msra.gmra.mrb[0].mxu1 %v788_v45 }
 0x169   : > { %v790_v47 = vpop.f32.mrb[5].mxu0 }
 0x16a   : > { %v791_v48 = vadd.f32 %v790_v47, %v789_v46 }
 0x16c   : > { %v792_v49 = vpop.f32.mrb[6].mxu0  ;;  %898 = vmatprep.mubr.f32.mxu1 %v791_v48 }
 0x16d   : > { %v793_v50 = vpop.f32.mrb[7].mxu0 }
 0x16e   : > { %v794_v51 = vadd.f32 %v793_v50, %v792_v49 }
 0x170   : > { %v795_v52 = vpop.f32.mrb[8].mxu0  ;;  %899 = vmatmul.mubr.f32.gmra.mrb[2].mxu1 %v794_v51 }
 0x171   : > { %v796_v53 = vpop.f32.mrb[9].mxu0 }
 0x172   : > { %v797_v54 = vadd.f32 %v796_v53, %v795_v52 }
 0x174   : > { %v798_v55 = vpop.f32.mrb[10].mxu0  ;;  %901 = vmatprep.mubr.f32.mxu1 %v797_v54 }
 0x175   : > { %v799_v56 = vpop.f32.mrb[11].mxu0 }
 0x176   : > { %v800_v57 = vadd.f32 %v799_v56, %v798_v55 }
 0x178   : > { %v801_v58 = vpop.f32.mrb[12].mxu0  ;;  %902 = vmatmul.mubr.f32.gmra.mrb[4].mxu1 %v800_v57 }
 0x179   : > { %v802_v59 = vpop.f32.mrb[13].mxu0 }
 0x17a   : > { %v803_v60 = vadd.f32 %v802_v59, %v801_v58 }
 0x17c   : > { %v804_v61 = vpop.f32.mrb[14].mxu0  ;;  %904 = vmatprep.mubr.f32.mxu1 %v803_v60 }
 0x17d   : > { %v805_v62 = vpop.f32.mrb[15].mxu0 }
 0x17e   : > { %v806_v63 = vadd.f32 %v805_v62, %v804_v61 }
 0x180   : > { %v807_v0 = vpop.f32.mrb[16].mxu0  ;;  %905 = vmatmul.mubr.f32.gmra.mrb[6].mxu1 %v806_v63 }
 0x181   : > { %v808_v1 = vpop.f32.mrb[17].mxu0 }
 0x182   : > { %v809_v2 = vadd.f32 %v808_v1, %v807_v0 }
 0x184   : > { %v810_v3 = vpop.f32.mrb[18].mxu0  ;;  %907 = vmatprep.mubr.f32.mxu1 %v809_v2 }
 0x185   : > { %v811_v4 = vpop.f32.mrb[19].mxu0 }
 0x186   : > { %v812_v5 = vadd.f32 %v811_v4, %v810_v3 }
 0x188   : > { %v813_v6 = vpop.f32.mrb[20].mxu0  ;;  %908 = vmatmul.mubr.f32.gmra.mrb[8].mxu1 %v812_v5 }
 0x189   : > { %v814_v7 = vpop.f32.mrb[21].mxu0 }
 0x18a   : > { %v815_v8 = vadd.f32 %v814_v7, %v813_v6 }
 0x18c   : > { %v816_v9 = vpop.f32.mrb[22].mxu0  ;;  %910 = vmatprep.mubr.f32.mxu1 %v815_v8 }
 0x18d   : > { %v817_v10 = vpop.f32.mrb[23].mxu0 }
 0x18e   : > { %v818_v11 = vadd.f32 %v817_v10, %v816_v9 }
 0x190   : > { %v819_v12 = vpop.f32.mrb[24].mxu0  ;;  %911 = vmatmul.mubr.f32.gmra.mrb[10].mxu1 %v818_v11 }
 0x191   : > { %v820_v13 = vpop.f32.mrb[25].mxu0 }
 0x192   : > { %v821_v14 = vadd.f32 %v820_v13, %v819_v12 }
 0x194   : > { %v822_v15 = vpop.f32.mrb[26].mxu0  ;;  %913 = vmatprep.mubr.f32.mxu1 %v821_v14 }
 0x195   : > { %v823_v16 = vpop.f32.mrb[27].mxu0 }
 0x196   : > { %v824_v17 = vadd.f32 %v823_v16, %v822_v15 }
 0x198   : > { %v825_v18 = vpop.f32.mrb[28].mxu0  ;;  %914 = vmatmul.mubr.f32.gmra.mrb[12].mxu1 %v824_v17 }
 0x199   : > { %v826_v19 = vpop.f32.mrb[29].mxu0 }
 0x19a   : > { %v827_v20 = vadd.f32 %v826_v19, %v825_v18 }
 0x19c   : > { %v828_v21 = vpop.f32.mrb[30].mxu0  ;;  %916 = vmatprep.mubr.f32.mxu1 %v827_v20 }
 0x19d   : > { %v829_v22 = vpop.f32.mrb[31].mxu0 }
 0x19e   : > { %v830_v23 = vadd.f32 %v829_v22, %v828_v21 }
 0x1a0   : > { %917 = vmatmul.mubr.f32.gmra.mrb[14].mxu1 %v830_v23 }
 0x23b   : > { %v897_v24 = vpop.f32.mrb[0].mxu1 }
 0x23c   : > { %1056 = vtanh.f32 %v897_v24  ;;  %v512_v25 = vpop.f32.mrb[1].mxu1 }
 0x23d   : > { %1058 = vtanh.f32 %v512_v25 }
 0x243   : > { %v900_v26 = vpop.f32.mrb[2].mxu1 }
 0x244   : > { %1060 = vtanh.f32 %v900_v26  ;;  %v522_v27 = vpop.f32.mrb[3].mxu1 }
 0x245   : > { %1062 = vtanh.f32 %v522_v27 }
 0x246   : > { %v1057_v28 = vpop.eup %1056 }
 0x247   : > { %v1059_v29 = vpop.eup %1058  ;;  %608 = vst [vmem:[%s1495_s20 + $0x8] sm:$0xff] %v1057_v28 }
 0x248   : > { %607 = vst [vmem:[%s1495_s20] sm:$0xff] %v1059_v29 }
 0x24b   : > { %v903_v30 = vpop.f32.mrb[4].mxu1 }
 0x24c   : > { %1064 = vtanh.f32 %v903_v30  ;;  %v532_v31 = vpop.f32.mrb[5].mxu1 }
 0x24d   : > { %1066 = vtanh.f32 %v532_v31 }
 0x24e   : > { %v1061_v32 = vpop.eup %1060 }
 0x24f   : > { %v1063_v33 = vpop.eup %1062  ;;  %610 = vst [vmem:[%s1495_s20 + $0x18] sm:$0xff] %v1061_v32 }
 0x250   : > { %609 = vst [vmem:[%s1495_s20 + $0x10] sm:$0xff] %v1063_v33 }
 0x253   : > { %v906_v34 = vpop.f32.mrb[6].mxu1 }
 0x254   : > { %1068 = vtanh.f32 %v906_v34  ;;  %v542_v35 = vpop.f32.mrb[7].mxu1 }
 0x255   : > { %1070 = vtanh.f32 %v542_v35 }
 0x256   : > { %v1065_v36 = vpop.eup %1064 }
 0x257   : > { %v1067_v37 = vpop.eup %1066  ;;  %612 = vst [vmem:[%s1495_s20 + $0x28] sm:$0xff] %v1065_v36 }
 0x258   : > { %611 = vst [vmem:[%s1495_s20 + $0x20] sm:$0xff] %v1067_v37 }
 0x25b   : > { %v909_v38 = vpop.f32.mrb[8].mxu1 }
 0x25c   : > { %1072 = vtanh.f32 %v909_v38  ;;  %v552_v39 = vpop.f32.mrb[9].mxu1 }
 0x25d   : > { %1074 = vtanh.f32 %v552_v39 }
 0x25e   : > { %v1069_v40 = vpop.eup %1068 }
 0x25f   : > { %v1071_v41 = vpop.eup %1070  ;;  %614 = vst [vmem:[%s1495_s20 + $0x38] sm:$0xff] %v1069_v40 }
 0x260   : > { %613 = vst [vmem:[%s1495_s20 + $0x30] sm:$0xff] %v1071_v41 }
 0x263   : > { %v912_v42 = vpop.f32.mrb[10].mxu1 }
 0x264   : > { %1076 = vtanh.f32 %v912_v42  ;;  %v562_v43 = vpop.f32.mrb[11].mxu1 }
 0x265   : > { %1078 = vtanh.f32 %v562_v43 }
 0x266   : > { %v1073_v44 = vpop.eup %1072 }
 0x267   : > { %v1075_v45 = vpop.eup %1074  ;;  %616 = vst [vmem:[%s1495_s20 + $0x48] sm:$0xff] %v1073_v44 }
 0x268   : > { %615 = vst [vmem:[%s1495_s20 + $0x40] sm:$0xff] %v1075_v45 }
 0x26b   : > { %v915_v46 = vpop.f32.mrb[12].mxu1 }
 0x26c   : > { %1080 = vtanh.f32 %v915_v46  ;;  %v572_v47 = vpop.f32.mrb[13].mxu1 }
 0x26d   : > { %1082 = vtanh.f32 %v572_v47 }
 0x26e   : > { %v1077_v48 = vpop.eup %1076 }
 0x26f   : > { %v1079_v49 = vpop.eup %1078  ;;  %618 = vst [vmem:[%s1495_s20 + $0x58] sm:$0xff] %v1077_v48 }
 0x270   : > { %617 = vst [vmem:[%s1495_s20 + $0x50] sm:$0xff] %v1079_v49 }
 0x273   : > { %v918_v50 = vpop.f32.mrb[14].mxu1 }
 0x274   : > { %1084 = vtanh.f32 %v918_v50  ;;  %v582_v51 = vpop.f32.mrb[15].mxu1 }
 0x275   : > { %1086 = vtanh.f32 %v582_v51 }
 0x276   : > { %v1081_v52 = vpop.eup %1080 }
 0x277   : > { %v1083_v53 = vpop.eup %1082  ;;  %620 = vst [vmem:[%s1495_s20 + $0x68] sm:$0xff] %v1081_v52 }
 0x278   : > { %619 = vst [vmem:[%s1495_s20 + $0x60] sm:$0xff] %v1083_v53 }
 0x27e   : > { %v1085_v54 = vpop.eup %1084 }
 0x27f   : > { %v1087_v55 = vpop.eup %1086  ;;  %622 = vst [vmem:[%s1495_s20 + $0x78] sm:$0xff] %v1085_v54 }
 0x280   : > { %621 = vst [vmem:[%s1495_s20 + $0x70] sm:$0xff] %v1087_v55 }
 0x281   : > { %1187 = shalt.err (!%p1184_p2)
}
 0x282   : > { %s1188_s7 = scalar_lea.hbm %s1516_s23, 2048  ;;  %s1192_s22 = scalar_lea.hbm %s1567_s3, 4096 }
 0x283   : > { %p1189_p13 = scmp.ne.s32.totalorder %s1516_s23, %s1188_s7  ;;  %p1193_p4 = scmp.lt.u32.totalorder %s1516_s23, %s1567_s3 }
 0x284   : > { %p1194_p5 = scmp.lt.u32.totalorder %s1192_s22, %s1188_s7  ;;  %p1196_p11 = scmp.lt.u32.totalorder %s1188_s7, %s1516_s23 }
 0x285   : > { %p1190_p6 = pnand %p1189_p13, %p1581_p0 }
 0x286   : > { %p1195_p8 = por %p1194_p5, %p1193_p4 }
 0x287   : > { %p1191_p10 = pneg %p1190_p6 }
 0x288   : > { %p1197_p1 = por %p1196_p11, %p1195_p8 }
 0x28a   : > { %p1198_p3 = pnand %p1197_p1, %p1191_p10 }
 0x28c   : > { %1201 = shalt.err (!%p1198_p3)
}
 0x28d   : > { %s1254_s18 = smov 128   ;;  %s1255_s20 = smov 8  }
 0x28e   : > { %993 = dma.vmem_to_hbm [thread:$0]  (%p1581_p0), %s1518_s24, 2048, %s1516_s23, %s624_s5, %s1254_s18, %s1254_s18, %s1255_s20  }
 0x28f PF: > { %s652_s17 = sand.u32 1, %s1232_s12   ;;  %p1582_p7 = scmp.ne.s32.totalorder %s1572_s19, 0 }
 0x290   : > { %p1583_p9 = scmp.ge.s32.totalorder %s1244_s15, 2  ;;  %s653_s26 = scalar_lea.sflag [#allocation4], %s652_s17 }
 0x292   : > { %p1007_p12 = pnand %p1583_p9, %p1582_p7 }
 0x294   : > { %1227 = dma.done.wait (!%p1007_p12), %s653_s26, 2048  }
 0x295   : > { %1229 = vsyncadd (!%p1007_p12), %s653_s26, 4294965248  ;;  %p17_p2 = scmp.ge.s32.totalorder %s1386_s4, 4   ;;  %s1584_s12 = smov %s1236_s13 }
 0x296   : > { %s1585_s13 = smov %s1240_s14  ;;  %s1586_s14 = smov %s1402_s9 }
 0x297   : > { %s1587_s15 = smov %s1386_s4  ;;  %19 = sbr.rel (!%p17_p2) target bundleno = 6 (0x6), region = 85 }
 0x29e   :  { %658 = vsyncpa [#allocation3], 1 }
 0x29f   :  { %660 = vsyncpa [#allocation3 + $0x1], 1 }
 0x2a0   :  { %661 = vsyncpa [#allocation6], 1 }
 0x2a1   :  { %662 = vsyncpa [#allocation4], 1 }
 0x2a2   :  { %664 = vsyncpa [#allocation4 + $0x1], 1 }

</bundles_post_ra>
